<compile_context>
chip_gen: v7x
topology: tpu7x:2x2x1
jax: 0.10.0
libtpu: 0.0.40
codegen_flags: <defaults>
</compile_context>

<pallas_src>
import jax
import jax.numpy as jnp
from jax.experimental import pallas as pl
from jax.experimental.pallas import tpu as pltpu

BN_EPS = 1e-5
LEAKY_SLOPE = 0.2


def _bn_leaky(y, gamma, beta):
    """Training-mode BatchNorm (per-channel stats over the lane/pixel axis) + LeakyReLU(0.2).

    y: (C, M) pre-activation, channels on sublanes, pixels on lanes.  gamma/beta: (C, 1).
    """
    _, m = y.shape
    ones = jnp.ones((m, 1), jnp.float32)
    # One-pass stats; the reductions ride the (otherwise idle) MXU instead of the XLU.
    s = jnp.dot(y, ones, preferred_element_type=jnp.float32)        # (C, 1) sum
    ss = jnp.dot(y * y, ones, preferred_element_type=jnp.float32)   # (C, 1) sum of squares
    inv_m = 1.0 / m
    mean = s * inv_m
    var = ss * inv_m - mean * mean
    scale = gamma * jax.lax.rsqrt(var + BN_EPS)                     # (C, 1)
    shift = beta - mean * scale                                     # (C, 1)
    z = y * scale + shift                                           # folded affine: 2 VPU ops/elt
    return jnp.where(z > 0, z, LEAKY_SLOPE * z)


def _fused_kernel(xt_ref, w1_ref, g1_ref, b1_ref, s1t_ref,
                  w2_ref, g2_ref, b2_ref, s2t_ref,
                  w3_ref, g3_ref, b3_ref, o_ref):
    xt = xt_ref[...]                       # (Cin, M1)  pixels on lanes
    w1 = w1_ref[...]                       # (C1, Cin)  Cin == 3

    # ---- layer 1: 1x1 conv with Cin=3 as 3 broadcast-FMAs (VPU), not a padded K=3 MXU matmul ----
    y1 = w1[:, 0:1] * xt[0:1, :]
    y1 = y1 + w1[:, 1:2] * xt[1:2, :]
    y1 = y1 + w1[:, 2:3] * xt[2:3, :]      # (C1, M1)
    h1 = _bn_leaky(y1, g1_ref[...], b1_ref[...])

    # ---- stride-2 spatial subsample = 0/1 selection matmul on the MXU ----
    h1s = jnp.dot(h1, s1t_ref[...], preferred_element_type=jnp.float32)   # (C1, M2)

    # ---- layer 2 ----
    y2 = jnp.dot(w2_ref[...], h1s, preferred_element_type=jnp.float32)    # (C2, M2)
    h2 = _bn_leaky(y2, g2_ref[...], b2_ref[...])

    h2s = jnp.dot(h2, s2t_ref[...], preferred_element_type=jnp.float32)   # (C2, M3)

    # ---- layer 3 (Cout=1): emits a lane-dense (1, M3) row directly ----
    y3 = jnp.dot(w3_ref[...], h2s, preferred_element_type=jnp.float32)    # (1, M3)
    h3 = _bn_leaky(y3, g3_ref[...], b3_ref[...])

    # Sigmoid: exp on the EUP + reciprocal.
    o_ref[...] = pl.reciprocal(1.0 + jnp.exp(-h3))


def _subsample_matrix(n, h, w):
    """S^T for a 1x1 stride-2 conv: shape (n*h*w, n*ho*wo), one-hot columns at kept pixels.

    Applying `act @ S^T` to a (C, n*h*w) activation subsamples its pixel (lane) axis on the MXU,
    keeping positions with even h and even w, ordered (n, ho, wo).
    """
    ho, wo = (h + 1) // 2, (w + 1) // 2
    src = (jnp.arange(n)[:, None, None] * (h * w)
           + (2 * jnp.arange(ho))[None, :, None] * w
           + (2 * jnp.arange(wo))[None, None, :]).reshape(-1)
    m_src, m_dst = n * h * w, n * ho * wo
    return jnp.zeros((m_src, m_dst), jnp.float32).at[src, jnp.arange(m_dst)].set(1.0)


def init_params(key):
    """Deterministic synthetic parameters (PyTorch layout: conv weight is (Cout, Cin)).

    Conv bias is intentionally omitted: with training-mode BatchNorm it is exactly cancelled by
    the mean subtraction, so dropping it preserves the forward-pass semantics.
    """
    layer_dims = [(3, 64), (64, 128), (128, 1)]
    params = []
    for i, (cin, cout) in enumerate(layer_dims):
        kw, kg, kb = jax.random.split(jax.random.fold_in(key, i), 3)
        w = jax.random.normal(kw, (cout, cin), jnp.float32) * 0.1
        gamma = 1.0 + 0.1 * jax.random.normal(kg, (cout, 1), jnp.float32)
        beta = 0.05 * jax.random.normal(kb, (cout, 1), jnp.float32)
        params.append((w, gamma, beta))
    return params


def pixel_discriminator(x_nchw, params):
    """Forward pass matching the PyTorch PixelDiscriminator (training-mode BatchNorm)."""
    x = x_nchw.astype(jnp.float32)
    n, cin, h, w = x.shape

    # stride-2 of the first 1x1 conv, applied once to the raw HBM input in the wrapper.
    xs = x[:, :, ::2, ::2]
    h1, w1sp = xs.shape[2], xs.shape[3]
    h2, w2sp = (h1 + 1) // 2, (w1sp + 1) // 2
    h3, w3sp = (h2 + 1) // 2, (w2sp + 1) // 2
    m1, m2, m3 = n * h1 * w1sp, n * h2 * w2sp, n * h3 * w3sp

    # Channel-major rows: (Cin, M1) with the pixel axis on TPU lanes (natural for NCHW input).
    xt = jnp.transpose(xs, (1, 0, 2, 3)).reshape(cin, m1)

    s1t = _subsample_matrix(n, h1, w1sp)   # (M1, M2)
    s2t = _subsample_matrix(n, h2, w2sp)   # (M2, M3)

    (wt1, g1, b1), (wt2, g2, b2), (wt3, g3, b3) = params
    c1, c2, c3 = wt1.shape[0], wt2.shape[0], wt3.shape[0]

    # Rough VMEM footprint of the single fused block (weights + selection mats + intermediates);
    # guard so the "everything resident" assumption never silently overflows VMEM.
    vmem_bytes = 4 * (2 * (xt.size + s1t.size + s2t.size + wt1.size + wt2.size + wt3.size)
                      + c1 * m1 + c1 * m2 + c2 * m2 + c2 * m3 + m3)
    assert vmem_bytes < 8 * 1024 * 1024, (
        "inputs too large for the single fused block; see TODO(synk) about M-tiled two-pass BN")

    def full(shape):
        return pl.BlockSpec(shape, lambda: (0,) * len(shape))

    out_row = pl.pallas_call(
        _fused_kernel,
        out_shape=jax.ShapeDtypeStruct((1, m3), jnp.float32),
        in_specs=[
            full((cin, m1)),
            full((c1, cin)), full((c1, 1)), full((c1, 1)), full((m1, m2)),
            full((c2, c1)), full((c2, 1)), full((c2, 1)), full((m2, m3)),
            full((c3, c2)), full((c3, 1)), full((c3, 1)),
        ],
        out_specs=full((1, m3)),
        compiler_params=pltpu.CompilerParams(vmem_limit_bytes=32 * 1024 * 1024),
    )(xt, wt1, g1, b1, s1t, wt2, g2, b2, s2t, wt3, g3, b3)

    return out_row.reshape(n, h3, w3sp)[:, None, :, :]   # NCHW, Cout = 1


def _reference(x_nchw, params):
    """Pure-JAX NCHW reference (PyTorch semantics, training-mode BatchNorm)."""
    y = x_nchw.astype(jnp.float32)
    n_layers = len(params)
    for li, (w, gamma, beta) in enumerate(params):
        y = y[:, :, ::2, ::2]                          # 1x1 conv, stride 2
        y = jnp.einsum("oc,nchw->nohw", w, y)
        mean = jnp.mean(y, axis=(0, 2, 3), keepdims=True)
        var = jnp.mean((y - mean) ** 2, axis=(0, 2, 3), keepdims=True)
        y = (y - mean) / jnp.sqrt(var + BN_EPS)
        y = y * gamma.reshape(1, -1, 1, 1) + beta.reshape(1, -1, 1, 1)
        y = jnp.where(y > 0, y, LEAKY_SLOPE * y)
        if li == n_layers - 1:
            y = jax.nn.sigmoid(y)
    return y


if __name__ == "__main__":
    key = jax.random.PRNGKey(0)
    kx, kp = jax.random.split(key)

    # NCHW input, like PyTorch: batch=2, channels=3, spatial=16x16
    x = jax.random.normal(kx, (2, 3, 16, 16), jnp.float32)
    params = init_params(kp)

    out = pixel_discriminator(x, params)
    out = jax.block_until_ready(out)

    ref = _reference(x, params)
    assert out.shape == (2, 1, 2, 2), out.shape
    err = float(jnp.max(jnp.abs(out - ref)))
    assert err < 1e-4, err

    print("KERNEL_OK")
</pallas_src>

<mosaic_0001>
module attributes {stable_mosaic.version = 11 : i64} {
  func.func @_fused_kernel(%arg0: memref<3x128xf32, #tpu.memory_space<vmem>>, %arg1: memref<64x3xf32, #tpu.memory_space<vmem>>, %arg2: memref<64x1xf32, #tpu.memory_space<vmem>>, %arg3: memref<64x1xf32, #tpu.memory_space<vmem>>, %arg4: memref<128x32xf32, #tpu.memory_space<vmem>>, %arg5: memref<128x64xf32, #tpu.memory_space<vmem>>, %arg6: memref<128x1xf32, #tpu.memory_space<vmem>>, %arg7: memref<128x1xf32, #tpu.memory_space<vmem>>, %arg8: memref<32x8xf32, #tpu.memory_space<vmem>>, %arg9: memref<1x128xf32, #tpu.memory_space<vmem>>, %arg10: memref<1x1xf32, #tpu.memory_space<vmem>>, %arg11: memref<1x1xf32, #tpu.memory_space<vmem>>, %arg12: memref<1x8xf32, #tpu.memory_space<vmem>>) attributes {dimension_semantics = [], scalar_prefetch = 0 : i64, scratch_operands = 0 : i64, tpu.core_type = #tpu.core_type<tc>} {
    %c0 = arith.constant 0 : index
    %c0_0 = arith.constant 0 : index
    %0 = vector.load %arg0[%c0, %c0_0] : memref<3x128xf32, #tpu.memory_space<vmem>>, vector<3x128xf32>
    %c0_1 = arith.constant 0 : index
    %c0_2 = arith.constant 0 : index
    %1 = vector.load %arg1[%c0_1, %c0_2] : memref<64x3xf32, #tpu.memory_space<vmem>>, vector<64x3xf32>
    %2 = vector.extract_strided_slice %1 {offsets = [0, 0], sizes = [64, 1], strides = [1, 1]} : vector<64x3xf32> to vector<64x1xf32>
    %3 = vector.extract_strided_slice %0 {offsets = [0, 0], sizes = [1, 128], strides = [1, 1]} : vector<3x128xf32> to vector<1x128xf32>
    %4 = vector.broadcast %2 : vector<64x1xf32> to vector<64x128xf32>
    %5 = vector.broadcast %3 : vector<1x128xf32> to vector<64x128xf32>
    %6 = arith.mulf %4, %5 : vector<64x128xf32>
    %7 = vector.extract_strided_slice %1 {offsets = [0, 1], sizes = [64, 1], strides = [1, 1]} : vector<64x3xf32> to vector<64x1xf32>
    %8 = vector.extract_strided_slice %0 {offsets = [1, 0], sizes = [1, 128], strides = [1, 1]} : vector<3x128xf32> to vector<1x128xf32>
    %9 = vector.broadcast %7 : vector<64x1xf32> to vector<64x128xf32>
    %10 = vector.broadcast %8 : vector<1x128xf32> to vector<64x128xf32>
    %11 = arith.mulf %9, %10 : vector<64x128xf32>
    %12 = arith.addf %6, %11 : vector<64x128xf32>
    %13 = vector.extract_strided_slice %1 {offsets = [0, 2], sizes = [64, 1], strides = [1, 1]} : vector<64x3xf32> to vector<64x1xf32>
    %14 = vector.extract_strided_slice %0 {offsets = [2, 0], sizes = [1, 128], strides = [1, 1]} : vector<3x128xf32> to vector<1x128xf32>
    %15 = vector.broadcast %13 : vector<64x1xf32> to vector<64x128xf32>
    %16 = vector.broadcast %14 : vector<1x128xf32> to vector<64x128xf32>
    %17 = arith.mulf %15, %16 : vector<64x128xf32>
    %18 = arith.addf %12, %17 : vector<64x128xf32>
    %c0_3 = arith.constant 0 : index
    %c0_4 = arith.constant 0 : index
    %19 = vector.load %arg2[%c0_3, %c0_4] : memref<64x1xf32, #tpu.memory_space<vmem>>, vector<64x1xf32>
    %c0_5 = arith.constant 0 : index
    %c0_6 = arith.constant 0 : index
    %20 = vector.load %arg3[%c0_5, %c0_6] : memref<64x1xf32, #tpu.memory_space<vmem>>, vector<64x1xf32>
    %cst = arith.constant 1.000000e+00 : f32
    %21 = vector.broadcast %cst : f32 to vector<128x1xf32>
    %cst_7 = arith.constant dense<0.000000e+00> : vector<64x1xf32>
    %22 = tpu.matmul %18, %21, %cst_7 {dimension_numbers = #tpu.dot_dimension_numbers<[1], [0], [0], [1], [0, 0, 1, 1], [], []>} : vector<64x128xf32>, vector<128x1xf32>, vector<64x1xf32> -> vector<64x1xf32>
    %23 = arith.mulf %18, %18 : vector<64x128xf32>
    %cst_8 = arith.constant dense<0.000000e+00> : vector<64x1xf32>
    %24 = tpu.matmul %23, %21, %cst_8 {dimension_numbers = #tpu.dot_dimension_numbers<[1], [0], [0], [1], [0, 0, 1, 1], [], []>} : vector<64x128xf32>, vector<128x1xf32>, vector<64x1xf32> -> vector<64x1xf32>
    %cst_9 = arith.constant 7.812500e-03 : f32
    %25 = vector.broadcast %cst_9 : f32 to vector<64x1xf32>
    %26 = arith.mulf %22, %25 : vector<64x1xf32>
    %cst_10 = arith.constant 7.812500e-03 : f32
    %27 = vector.broadcast %cst_10 : f32 to vector<64x1xf32>
    %28 = arith.mulf %24, %27 : vector<64x1xf32>
    %29 = arith.mulf %26, %26 : vector<64x1xf32>
    %30 = arith.subf %28, %29 : vector<64x1xf32>
    %cst_11 = arith.constant 9.99999974E-6 : f32
    %31 = vector.broadcast %cst_11 : f32 to vector<64x1xf32>
    %32 = arith.addf %30, %31 : vector<64x1xf32>
    %33 = math.rsqrt %32 : vector<64x1xf32>
    %34 = arith.mulf %19, %33 : vector<64x1xf32>
    %35 = arith.mulf %26, %34 : vector<64x1xf32>
    %36 = arith.subf %20, %35 : vector<64x1xf32>
    %37 = vector.broadcast %34 : vector<64x1xf32> to vector<64x128xf32>
    %38 = arith.mulf %18, %37 : vector<64x128xf32>
    %39 = vector.broadcast %36 : vector<64x1xf32> to vector<64x128xf32>
    %40 = arith.addf %38, %39 : vector<64x128xf32>
    %cst_12 = arith.constant 0.000000e+00 : f32
    %41 = vector.broadcast %cst_12 : f32 to vector<64x128xf32>
    %42 = arith.cmpf ogt, %40, %41 : vector<64x128xf32>
    %cst_13 = arith.constant 2.000000e-01 : f32
    %43 = vector.broadcast %cst_13 : f32 to vector<64x128xf32>
    %44 = arith.mulf %43, %40 : vector<64x128xf32>
    %45 = arith.select %42, %40, %44 : vector<64x128xi1>, vector<64x128xf32>
    %c0_14 = arith.constant 0 : index
    %c0_15 = arith.constant 0 : index
    %46 = vector.load %arg4[%c0_14, %c0_15] : memref<128x32xf32, #tpu.memory_space<vmem>>, vector<128x32xf32>
    %cst_16 = arith.constant dense<0.000000e+00> : vector<64x32xf32>
    %47 = tpu.matmul %45, %46, %cst_16 {dimension_numbers = #tpu.dot_dimension_numbers<[1], [0], [0], [1], [0, 0, 1, 1], [], []>} : vector<64x128xf32>, vector<128x32xf32>, vector<64x32xf32> -> vector<64x32xf32>
    %c0_17 = arith.constant 0 : index
    %c0_18 = arith.constant 0 : index
    %48 = vector.load %arg5[%c0_17, %c0_18] : memref<128x64xf32, #tpu.memory_space<vmem>>, vector<128x64xf32>
    %cst_19 = arith.constant dense<0.000000e+00> : vector<128x32xf32>
    %49 = tpu.matmul %48, %47, %cst_19 {dimension_numbers = #tpu.dot_dimension_numbers<[1], [0], [0], [1], [0, 0, 1, 1], [], []>} : vector<128x64xf32>, vector<64x32xf32>, vector<128x32xf32> -> vector<128x32xf32>
    %c0_20 = arith.constant 0 : index
    %c0_21 = arith.constant 0 : index
    %50 = vector.load %arg6[%c0_20, %c0_21] : memref<128x1xf32, #tpu.memory_space<vmem>>, vector<128x1xf32>
    %c0_22 = arith.constant 0 : index
    %c0_23 = arith.constant 0 : index
    %51 = vector.load %arg7[%c0_22, %c0_23] : memref<128x1xf32, #tpu.memory_space<vmem>>, vector<128x1xf32>
    %cst_24 = arith.constant 1.000000e+00 : f32
    %52 = vector.broadcast %cst_24 : f32 to vector<32x1xf32>
    %cst_25 = arith.constant dense<0.000000e+00> : vector<128x1xf32>
    %53 = tpu.matmul %49, %52, %cst_25 {dimension_numbers = #tpu.dot_dimension_numbers<[1], [0], [0], [1], [0, 0, 1, 1], [], []>} : vector<128x32xf32>, vector<32x1xf32>, vector<128x1xf32> -> vector<128x1xf32>
    %54 = arith.mulf %49, %49 : vector<128x32xf32>
    %cst_26 = arith.constant dense<0.000000e+00> : vector<128x1xf32>
    %55 = tpu.matmul %54, %52, %cst_26 {dimension_numbers = #tpu.dot_dimension_numbers<[1], [0], [0], [1], [0, 0, 1, 1], [], []>} : vector<128x32xf32>, vector<32x1xf32>, vector<128x1xf32> -> vector<128x1xf32>
    %cst_27 = arith.constant 3.125000e-02 : f32
    %56 = vector.broadcast %cst_27 : f32 to vector<128x1xf32>
    %57 = arith.mulf %53, %56 : vector<128x1xf32>
    %cst_28 = arith.constant 3.125000e-02 : f32
    %58 = vector.broadcast %cst_28 : f32 to vector<128x1xf32>
    %59 = arith.mulf %55, %58 : vector<128x1xf32>
    %60 = arith.mulf %57, %57 : vector<128x1xf32>
    %61 = arith.subf %59, %60 : vector<128x1xf32>
    %cst_29 = arith.constant 9.99999974E-6 : f32
    %62 = vector.broadcast %cst_29 : f32 to vector<128x1xf32>
    %63 = arith.addf %61, %62 : vector<128x1xf32>
    %64 = math.rsqrt %63 : vector<128x1xf32>
    %65 = arith.mulf %50, %64 : vector<128x1xf32>
    %66 = arith.mulf %57, %65 : vector<128x1xf32>
    %67 = arith.subf %51, %66 : vector<128x1xf32>
    %68 = vector.broadcast %65 : vector<128x1xf32> to vector<128x32xf32>
    %69 = arith.mulf %49, %68 : vector<128x32xf32>
    %70 = vector.broadcast %67 : vector<128x1xf32> to vector<128x32xf32>
    %71 = arith.addf %69, %70 : vector<128x32xf32>
    %cst_30 = arith.constant 0.000000e+00 : f32
    %72 = vector.broadcast %cst_30 : f32 to vector<128x32xf32>
    %73 = arith.cmpf ogt, %71, %72 : vector<128x32xf32>
    %cst_31 = arith.constant 2.000000e-01 : f32
    %74 = vector.broadcast %cst_31 : f32 to vector<128x32xf32>
    %75 = arith.mulf %74, %71 : vector<128x32xf32>
    %76 = arith.select %73, %71, %75 : vector<128x32xi1>, vector<128x32xf32>
    %c0_32 = arith.constant 0 : index
    %c0_33 = arith.constant 0 : index
    %77 = vector.load %arg8[%c0_32, %c0_33] : memref<32x8xf32, #tpu.memory_space<vmem>>, vector<32x8xf32>
    %cst_34 = arith.constant dense<0.000000e+00> : vector<128x8xf32>
    %78 = tpu.matmul %76, %77, %cst_34 {dimension_numbers = #tpu.dot_dimension_numbers<[1], [0], [0], [1], [0, 0, 1, 1], [], []>} : vector<128x32xf32>, vector<32x8xf32>, vector<128x8xf32> -> vector<128x8xf32>
    %c0_35 = arith.constant 0 : index
    %c0_36 = arith.constant 0 : index
    %79 = vector.load %arg9[%c0_35, %c0_36] : memref<1x128xf32, #tpu.memory_space<vmem>>, vector<1x128xf32>
    %cst_37 = arith.constant dense<0.000000e+00> : vector<1x8xf32>
    %80 = tpu.matmul %79, %78, %cst_37 {dimension_numbers = #tpu.dot_dimension_numbers<[1], [0], [0], [1], [0, 0, 1, 1], [], []>} : vector<1x128xf32>, vector<128x8xf32>, vector<1x8xf32> -> vector<1x8xf32>
    %c0_38 = arith.constant 0 : index
    %c0_39 = arith.constant 0 : index
    %81 = vector.load %arg10[%c0_38, %c0_39] : memref<1x1xf32, #tpu.memory_space<vmem>>, vector<1x1xf32>
    %c0_40 = arith.constant 0 : index
    %c0_41 = arith.constant 0 : index
    %82 = vector.load %arg11[%c0_40, %c0_41] : memref<1x1xf32, #tpu.memory_space<vmem>>, vector<1x1xf32>
    %cst_42 = arith.constant 1.000000e+00 : f32
    %83 = vector.broadcast %cst_42 : f32 to vector<8x1xf32>
    %cst_43 = arith.constant dense<0.000000e+00> : vector<1x1xf32>
    %84 = tpu.matmul %80, %83, %cst_43 {dimension_numbers = #tpu.dot_dimension_numbers<[1], [0], [0], [1], [0, 0, 1, 1], [], []>} : vector<1x8xf32>, vector<8x1xf32>, vector<1x1xf32> -> vector<1x1xf32>
    %85 = arith.mulf %80, %80 : vector<1x8xf32>
    %cst_44 = arith.constant dense<0.000000e+00> : vector<1x1xf32>
    %86 = tpu.matmul %85, %83, %cst_44 {dimension_numbers = #tpu.dot_dimension_numbers<[1], [0], [0], [1], [0, 0, 1, 1], [], []>} : vector<1x8xf32>, vector<8x1xf32>, vector<1x1xf32> -> vector<1x1xf32>
    %cst_45 = arith.constant 1.250000e-01 : f32
    %87 = vector.broadcast %cst_45 : f32 to vector<1x1xf32>
    %88 = arith.mulf %84, %87 : vector<1x1xf32>
    %cst_46 = arith.constant 1.250000e-01 : f32
    %89 = vector.broadcast %cst_46 : f32 to vector<1x1xf32>
    %90 = arith.mulf %86, %89 : vector<1x1xf32>
    %91 = arith.mulf %88, %88 : vector<1x1xf32>
    %92 = arith.subf %90, %91 : vector<1x1xf32>
    %cst_47 = arith.constant 9.99999974E-6 : f32
    %93 = vector.broadcast %cst_47 : f32 to vector<1x1xf32>
    %94 = arith.addf %92, %93 : vector<1x1xf32>
    %95 = math.rsqrt %94 : vector<1x1xf32>
    %96 = arith.mulf %81, %95 : vector<1x1xf32>
    %97 = arith.mulf %88, %96 : vector<1x1xf32>
    %98 = arith.subf %82, %97 : vector<1x1xf32>
    %99 = vector.broadcast %96 : vector<1x1xf32> to vector<1x8xf32>
    %100 = arith.mulf %80, %99 : vector<1x8xf32>
    %101 = vector.broadcast %98 : vector<1x1xf32> to vector<1x8xf32>
    %102 = arith.addf %100, %101 : vector<1x8xf32>
    %cst_48 = arith.constant 0.000000e+00 : f32
    %103 = vector.broadcast %cst_48 : f32 to vector<1x8xf32>
    %104 = arith.cmpf ogt, %102, %103 : vector<1x8xf32>
    %cst_49 = arith.constant 2.000000e-01 : f32
    %105 = vector.broadcast %cst_49 : f32 to vector<1x8xf32>
    %106 = arith.mulf %105, %102 : vector<1x8xf32>
    %107 = arith.select %104, %102, %106 : vector<1x8xi1>, vector<1x8xf32>
    %cst_50 = arith.constant 0.000000e+00 : f32
    %108 = vector.broadcast %cst_50 : f32 to vector<1x8xf32>
    %109 = arith.subf %108, %107 : vector<1x8xf32>
    %110 = math.exp %109 : vector<1x8xf32>
    %cst_51 = arith.constant 1.000000e+00 : f32
    %111 = vector.broadcast %cst_51 : f32 to vector<1x8xf32>
    %112 = arith.addf %111, %110 : vector<1x8xf32>
    %113 = tpu.reciprocal %112 : vector<1x8xf32> -> vector<1x8xf32>
    %c0_52 = arith.constant 0 : index
    %c0_53 = arith.constant 0 : index
    %114 = vector.load %arg12[%c0_52, %c0_53] : memref<1x8xf32, #tpu.memory_space<vmem>>, vector<1x8xf32>
    tpu.vector_store %arg12[%c0_52, %c0_53], %113 {strides = array<i32>} : memref<1x8xf32, #tpu.memory_space<vmem>>, vector<1x8xf32>,
    return
  }
}

</mosaic_0001>

<bundles_post_ra>
// kernel: tpu_custom_call.1
= control target key start
LH: loop header
LB: loop body
LE: loop exit
PB: predicated region body
PF: predicated region fallthrough
CT: control target
= control target key end

     0   :  { %s3810_s0 = inlined_call_operand.vmem [shape: f32[3,128], index: 0, kind: input, shape index: {}]   ;;  %s3811_s1 = inlined_call_operand.vmem [shape: f32[64,3], index: 1, kind: input, shape index: {}]   ;;  %s3812_s2 = inlined_call_operand.vmem [shape: f32[64,1], index: 2, kind: input, shape index: {}]   ;;  %s3813_s3 = inlined_call_operand.vmem [shape: f32[64,1], index: 3, kind: input, shape index: {}]   ;;  %s3814_s4 = inlined_call_operand.vmem [shape: f32[128,32], index: 4, kind: input, shape index: {}]   ;;  %s3815_s5 = inlined_call_operand.vmem [shape: f32[128,64], index: 5, kind: input, shape index: {}]   ;;  %s3816_s6 = inlined_call_operand.vmem [shape: f32[128,1], index: 6, kind: input, shape index: {}]   ;;  %s3817_s7 = inlined_call_operand.vmem [shape: f32[128,1], index: 7, kind: input, shape index: {}]   ;;  %s3818_s8 = inlined_call_operand.vmem [shape: f32[32,8], index: 8, kind: input, shape index: {}]   ;;  %s3819_s9 = inlined_call_operand.vmem [shape: f32[1,128], index: 9, kind: input, shape index: {}]   ;;  %s3820_s10 = inlined_call_operand.<no memory space> [shape: f32[1,1], index: 10, kind: input, shape index: {}]   ;;  %s3821_s12 = inlined_call_operand.hbm [shape: f32[1,8], index: 12, kind: output, shape index: {}]   ;;  %s3822_s11 = inlined_call_operand.<no memory space> [shape: f32[1,1], index: 11, kind: input, shape index: {}]  }
   0x1   :  { %v17_v0 = vstv %s3820_s10  ;;  %v19_v1 = vstv %s3822_s11 }
   0x2   :  { %18 = vst [vmem:[#allocation2] sm:$0x1] %v17_v0  ;;  %20 = vst [vmem:[#allocation3] sm:$0x1] %v19_v1 }
   0x3   :  { %v48_v2 = vld [vmem:[%s3811_s1 + $0x8] sm:$0xff]  ;;  %v47_v3 = vld [vmem:[%s3811_s1] sm:$0xff]  ;;  %v3042_v4 = vmov 1   ;;  %v3043_v5 = vmov 0   ;;  %v3044_v6 = vmov 1.0|1.0  }
   0x4   :  { %2947 = vset.pattern.permute.xlu0 %v3042_v4  ;;  %2949 = vset.pattern.permute.xlu1 %v3043_v5 }
   0x5   :  { %62 = vperm.xlu1 %2949, %v48_v2   ;;  %108 = vperm.xlu0 %2947, %v47_v3  }
   0x6   :  { %2814 = vmatprep.subr.bf16.mxu0 %v3044_v6  ;;  %2830 = vmatprep.subr.bf16.mxu1 %v3044_v6 }
   0x7   :  { %21 = vsyncpa [#allocation5], 0  ;;  %2815 = vmatpush3.bf16.msra.mxu0 %v3044_v6  ;;  %2831 = vmatpush3.bf16.msra.mxu1 %v3044_v6  ;;  %v50_v7 = vld [vmem:[%s3811_s1 + $0x18] sm:$0xff]  ;;  %v3045_v8 = vmov 2   ;;  %v52_v9 = vld [vmem:[%s3811_s1 + $0x28] sm:$0xff]  ;;  %v95_v14 = vlaneseq  ;;  %vm774_vm8 = vcmask 523264  }
   0x8   :  { %2816 = vmatprep.subr.bf16.mxu0 %v3044_v6  ;;  %2832 = vmatprep.subr.bf16.mxu1 %v3044_v6  ;;  %v49_v10 = vld [vmem:[%s3811_s1 + $0x10] sm:$0xff]  ;;  %v54_v11 = vld [vmem:[%s3811_s1 + $0x38] sm:$0xff]  ;;  %v51_v12 = vld [vmem:[%s3811_s1 + $0x20] sm:$0xff]  ;;  %vm1000_vm9 = vcmask 261120  }
   0x9   :  { %2950 = vset.pattern.permute.xlu1 %v3042_v4  ;;  %2948 = vset.pattern.permute.xlu0 %v3043_v5  ;;  %v53_v13 = vld [vmem:[%s3811_s1 + $0x30] sm:$0xff]  ;;  %v96_v15 = vshrl.u32 %v95_v14, 7  ;;  %v46_v20 = vld [vmem:[%s3810_s0] sm:$0x7] }
   0xa   :  { %112 = vperm.xlu1 %2950, %v48_v2   ;;  %57 = vperm.xlu0 %2948, %v47_v3  }
   0xb   :  { %2817 = vmatpush3.bf16.msra.mxu0 %v3044_v6  ;;  %2833 = vmatpush3.bf16.msra.mxu1 %v3044_v6  ;;  %v141_v16 = vsub.s32 1, %v96_v15  ;;  %v3190_v17 = vsub.s32 0, %v96_v15  ;;  %v193_v22 = vsub.s32 2, %v96_v15 }
   0xc   :  { %2818 = vmatprep.subr.bf16.mxu0 %v3044_v6  ;;  %2834 = vmatprep.subr.bf16.mxu1 %v3044_v6 }
   0xd   :  { %v3195_v21 = vrot.slane %v46_v20, %v141_v16  ;;  %v3198_v23 = vrot.slane %v46_v20, %v3190_v17  ;;  %v3202_v28 = vrot.slane %v46_v20, %v193_v22 }
   0xe   :  { %2951 = vset.pattern.permute.xlu1 %v3045_v8  ;;  %72 = vperm.xlu0 %2948, %v50_v7  }
   0xf   :  { %160 = vperm.xlu1 %2951, %v47_v3   ;;  %2819 = vmatpush3.bf16.msra.mxu0 %v3044_v6 }
  0x10   :  { %2835 = vmatpush3.bf16.msra.mxu1 %v3044_v6  ;;  %2820 = vmatprep.subr.bf16.mxu0 %v3044_v6 }
  0x11   :  { %2836 = vmatprep.subr.bf16.mxu1 %v3044_v6 }
  0x12   :  { %82 = vperm.xlu0 %2948, %v52_v9  }
  0x13   :  { %2952 = vset.pattern.permute.xlu1 %v3043_v5  ;;  %2821 = vmatpush3.bf16.msra.mxu0 %v3044_v6 }
  0x14   :  { %67 = vperm.xlu1 %2952, %v49_v10   ;;  %2837 = vmatpush3.bf16.msra.mxu1 %v3044_v6 }
  0x15   :  { %2822 = vmatprep.subr.bf16.mxu0 %v3044_v6  ;;  %2838 = vmatprep.subr.bf16.mxu1 %v3044_v6 }
  0x16   :  { %92 = vperm.xlu0 %2948, %v54_v11  }
  0x17   :  { %2823 = vmatpush3.bf16.msra.mxu0 %v3044_v6 }
  0x18   :  { %2953 = vset.pattern.permute.xlu1 %v3042_v4  ;;  %2839 = vmatpush3.bf16.msra.mxu1 %v3044_v6 }
  0x19   :  { %116 = vperm.xlu1 %2953, %v49_v10   ;;  %2824 = vmatprep.subr.bf16.mxu0 %v3044_v6 }
  0x1a   :  { %2960 = vset.pattern.permute.xlu0 %v3045_v8  ;;  %2840 = vmatprep.subr.bf16.mxu1 %v3044_v6 }
  0x1b   :  { %164 = vperm.xlu0 %2960, %v48_v2   ;;  %2825 = vmatpush3.bf16.msra.mxu0 %v3044_v6 }
  0x1c   :  { %2841 = vmatpush3.bf16.msra.mxu1 %v3044_v6  ;;  %2826 = vmatprep.subr.bf16.mxu0 %v3044_v6 }
  0x1d   :  { %120 = vperm.xlu1 %2953, %v50_v7   ;;  %2842 = vmatprep.subr.bf16.mxu1 %v3044_v6 }
  0x1f   :  { %172 = vperm.xlu0 %2960, %v50_v7   ;;  %2827 = vmatpush3.bf16.msra.mxu0 %v3044_v6 }
  0x20   :  { %2843 = vmatpush3.bf16.msra.mxu1 %v3044_v6  ;;  %2828 = vmatprep.subr.bf16.mxu0 %v3044_v6 }
  0x21   :  { %2954 = vset.pattern.permute.xlu1 %v3045_v8  ;;  %2844 = vmatprep.subr.bf16.mxu1 %v3044_v6 }
  0x22   :  { %168 = vperm.xlu1 %2954, %v49_v10  }
  0x23   :  { %180 = vperm.xlu0 %2960, %v52_v9   ;;  %2829 = vmatpush3.bf16.msra.mxu0 %v3044_v6 }
  0x24   :  { %2845 = vmatpush3.bf16.msra.mxu1 %v3044_v6 }
  0x26   :  { %2955 = vset.pattern.permute.xlu1 %v3043_v5 }
  0x27   :  { %77 = vperm.xlu1 %2955, %v51_v12   ;;  %188 = vperm.xlu0 %2960, %v54_v11  }
  0x2b   :  { %2956 = vset.pattern.permute.xlu1 %v3042_v4  ;;  %2963 = vset.pattern.permute.xlu0 %v3043_v5 }
  0x2c   :  { %124 = vperm.xlu1 %2956, %v51_v12  }
  0x30   :  { %128 = vperm.xlu1 %2956, %v52_v9  }
  0x34   :  { %2957 = vset.pattern.permute.xlu1 %v3045_v8 }
  0x35   :  { %176 = vperm.xlu1 %2957, %v51_v12  }
  0x39   :  { %2958 = vset.pattern.permute.xlu1 %v3043_v5 }
  0x3a   :  { %87 = vperm.xlu1 %2958, %v53_v13  }
  0x3e   :  { %2959 = vset.pattern.permute.xlu1 %v3042_v4 }
  0x3f   :  { %132 = vperm.xlu1 %2959, %v53_v13  }
  0x43   :  { %136 = vperm.xlu1 %2959, %v54_v11  }
  0x47   :  { %2961 = vset.pattern.permute.xlu1 %v3045_v8 }
  0x48   :  { %184 = vperm.xlu1 %2961, %v53_v13  }
  0x4c   :  { %2962 = vset.pattern.permute.xlu1 %v3043_v5 }
  0x84   :  { %v63_v18 = vpop.permute.xlu1 %62  ;;  %v109_v19 = vpop.permute.xlu0 %108 }
  0x85   :  { %v143_v24 = vmul.f32 %v3195_v21, %v109_v19  ;;  %v100_v40 = vmul.f32 %v3198_v23, %v63_v18 }
  0x89   :  { %v113_v25 = vpop.permute.xlu1 %112  ;;  %v58_v26 = vpop.permute.xlu0 %57 }
  0x8a   :  { %v99_v27 = vmul.f32 %v3198_v23, %v58_v26  ;;  %v144_v38 = vmul.f32 %v3195_v21, %v113_v25 }
  0x8c   :  { %v151_v29 = vadd.f32 %v143_v24, %v99_v27  ;;  %v152_v42 = vadd.f32 %v144_v38, %v100_v40  ;;  %v640_v38 = vld [vmem:[%s3814_s4 + $0x18] sm:$0xff]  ;;  %v641_v40 = vld [vmem:[%s3814_s4 + $0x20] sm:$0xff] }
  0x8d   :  { %v73_v30 = vpop.permute.xlu0 %72 }
  0x8e   :  { %v161_v31 = vpop.permute.xlu1 %160  ;;  %v102_v43 = vmul.f32 %v3198_v23, %v73_v30 }
  0x8f   :  { %v195_v32 = vmul.f32 %v3202_v28, %v161_v31 }
  0x91   :  { %v3205_v33 = vadd.f32 %v195_v32, %v151_v29  ;;  %v83_v34 = vpop.permute.xlu0 %82 }
  0x92   :  { %v104_v0 = vmul.f32 %v3198_v23, %v83_v34 }
  0x93   :  { %v68_v35 = vpop.permute.xlu1 %67  ;;  %2533 = vmatprep.mubr.f32.mxu0 %v3205_v33  ;;  %v332_v36 = vmul.f32 %v3205_v33, %v3205_v33 }
  0x94   :  { %v101_v53 = vmul.f32 %v3198_v23, %v68_v35 }
  0x95   :  { %2577 = vmatprep.mubr.f32.mxu1 %v332_v36  ;;  %v93_v37 = vpop.permute.xlu0 %92  ;;  %v639_v36 = vld [vmem:[%s3814_s4 + $0x10] sm:$0xff] }
  0x96   :  { %v106_v19 = vmul.f32 %v3198_v23, %v93_v37 }
  0x98   :  { %v117_v39 = vpop.permute.xlu1 %116 }
  0x99   :  { %v145_v48 = vmul.f32 %v3195_v21, %v117_v39  ;;  %v2850_v39 = vpack.c.bf16 %v640_v38, %v639_v36 }
  0x9a   :  { %v165_v41 = vpop.permute.xlu0 %164 }
  0x9b   :  { %v196_v44 = vmul.f32 %v3202_v28, %v165_v41  ;;  %v153_v55 = vadd.f32 %v145_v48, %v101_v53  ;;  %v642_v41 = vld [vmem:[%s3814_s4 + $0x28] sm:$0xff] }
  0x9c   :  { %v121_v45 = vpop.permute.xlu1 %120 }
  0x9d   :  { %v3214_v46 = vadd.f32 %v196_v44, %v152_v42  ;;  %v146_v47 = vmul.f32 %v3195_v21, %v121_v45  ;;  %v2854_v42 = vpack.c.bf16 %v642_v41, %v641_v40  ;;  %v644_v44 = vld [vmem:[%s3814_s4 + $0x38] sm:$0xff] }
  0x9e   :  { %v173_v49 = vpop.permute.xlu0 %172 }
  0x9f   :  { %v154_v50 = vadd.f32 %v146_v47, %v102_v43  ;;  %v198_v51 = vmul.f32 %v3202_v28, %v173_v49  ;;  %2534 = vmatmul.mubr.f32.vlgmr.msra.gmra.mrb[0].mxu0 %v3214_v46  ;;  %v333_v52 = vmul.f32 %v3214_v46, %v3214_v46  ;;  %v643_v43 = vld [vmem:[%s3814_s4 + $0x30] sm:$0xff] }
  0xa0   :  { %v2858_v45 = vpack.c.bf16 %v644_v44, %v643_v43 }
  0xa1   :  { %v169_v54 = vpop.permute.xlu1 %168  ;;  %2578 = vmatmul.mubr.f32.vlgmr.msra.gmra.mrb[0].mxu1 %v333_v52  ;;  %v3224_v57 = vadd.f32 %v198_v51, %v154_v50 }
  0xa2   :  { %v197_v56 = vmul.f32 %v3202_v28, %v169_v54  ;;  %v181_v5 = vpop.permute.xlu0 %180 }
  0xa3   :  { %v335_v61 = vmul.f32 %v3224_v57, %v3224_v57  ;;  %v200_v7 = vmul.f32 %v3202_v28, %v181_v5 }
  0xa4   :  { %v3226_v58 = vadd.f32 %v197_v56, %v153_v55 }
  0xa6   :  { %v78_v59 = vpop.permute.xlu1 %77  ;;  %2536 = vmatprep.mubr.f32.mxu0 %v3226_v58  ;;  %v334_v60 = vmul.f32 %v3226_v58, %v3226_v58  ;;  %v189_v22 = vpop.permute.xlu0 %188 }
  0xa7   :  { %2537 = vmatmul.mubr.f32.gmra.mrb[2].mxu0 %v3224_v57  ;;  %v103_v4 = vmul.f32 %v3198_v23, %v78_v59  ;;  %v202_v27 = vmul.f32 %v3202_v28, %v189_v22 }
  0xa8   :  { %2580 = vmatprep.mubr.f32.mxu1 %v334_v60 }
  0xa9   :  { %2581 = vmatmul.mubr.f32.gmra.mrb[2].mxu1 %v335_v61 }
  0xab   :  { %v125_v62 = vpop.permute.xlu1 %124 }
  0xac   :  { %v147_v2 = vmul.f32 %v3195_v21, %v125_v62 }
  0xae   :  { %v155_v9 = vadd.f32 %v147_v2, %v103_v4 }
  0xaf   :  { %v129_v63 = vpop.permute.xlu1 %128 }
  0xb0   :  { %v148_v1 = vmul.f32 %v3195_v21, %v129_v63 }
  0xb2   :  { %v156_v3 = vadd.f32 %v148_v1, %v104_v0 }
  0xb4   :  { %v177_v8 = vpop.permute.xlu1 %176  ;;  %v3240_v11 = vadd.f32 %v200_v7, %v156_v3 }
  0xb5   :  { %v199_v10 = vmul.f32 %v3202_v28, %v177_v8 }
  0xb6   :  { %v337_v15 = vmul.f32 %v3240_v11, %v3240_v11 }
  0xb7   :  { %v3242_v12 = vadd.f32 %v199_v10, %v155_v9 }
  0xb9   :  { %v88_v13 = vpop.permute.xlu1 %87  ;;  %2539 = vmatprep.mubr.f32.mxu0 %v3242_v12  ;;  %v336_v14 = vmul.f32 %v3242_v12, %v3242_v12 }
  0xba   :  { %2540 = vmatmul.mubr.f32.gmra.mrb[4].mxu0 %v3240_v11  ;;  %v105_v26 = vmul.f32 %v3198_v23, %v88_v13  ;;  %v637_v23 = vld [vmem:[%s3814_s4] sm:$0xff] }
  0xbb   :  { %2583 = vmatprep.mubr.f32.mxu1 %v336_v14 }
  0xbc   :  { %2584 = vmatmul.mubr.f32.gmra.mrb[4].mxu1 %v337_v15 }
  0xbe   :  { %v133_v16 = vpop.permute.xlu1 %132 }
  0xbf   :  { %v149_v24 = vmul.f32 %v3195_v21, %v133_v16  ;;  %v212_v16 = vld [vmem:[%s3812_s2 + $0x8] sm:$0xff] }
  0xc1   :  { %v157_v30 = vadd.f32 %v149_v24, %v105_v26  ;;  %v646_v26 = vld [vmem:[%s3814_s4 + $0x48] sm:$0xff] }
  0xc2   :  { %v137_v18 = vpop.permute.xlu1 %136 }
  0xc3   :  { %v150_v20 = vmul.f32 %v3195_v21, %v137_v18  ;;  %v211_v18 = vld [vmem:[%s3812_s2] sm:$0xff] }
  0xc5   :  { %v158_v25 = vadd.f32 %v150_v20, %v106_v19 }
  0xc7   :  { %v185_v29 = vpop.permute.xlu1 %184  ;;  %v3256_v32 = vadd.f32 %v202_v27, %v158_v25  ;;  %v645_v25 = vld [vmem:[%s3814_s4 + $0x40] sm:$0xff] }
  0xc8   :  { %v201_v31 = vmul.f32 %v3202_v28, %v185_v29  ;;  %v638_v28 = vld [vmem:[%s3814_s4 + $0x8] sm:$0xff]  ;;  %v2862_v29 = vpack.c.bf16 %v646_v26, %v645_v25 }
  0xc9   :  { %v339_v21 = vmul.f32 %v3256_v32, %v3256_v32  ;;  %v2846_v37 = vpack.c.bf16 %v638_v28, %v637_v23  ;;  %v648_v23 = vld [vmem:[%s3814_s4 + $0x58] sm:$0xff]  ;;  %v213_v28 = vld [vmem:[%s3812_s2 + $0x10] sm:$0xff]  ;;  %v224_v26 = vld [vmem:[%s3813_s3 + $0x28] sm:$0xff] }
  0xca   :  { %v3258_v34 = vadd.f32 %v201_v31, %v157_v30  ;;  %v220_v31 = vld [vmem:[%s3813_s3 + $0x8] sm:$0xff] }
  0xcb   :  { %2847 = vmatprep.subr.bf16.mxu0 %v2846_v37 }
  0xcc   :  { %2542 = vmatprep.mubr.f32.mxu0 %v3258_v34  ;;  %v338_v35 = vmul.f32 %v3258_v34, %v3258_v34  ;;  %2849 = vmatpush3.bf16.msra.mxu0 %v2846_v37 }
  0xcd   :  { %2543 = vmatmul.mubr.f32.gmra.mrb[6].mxu0 %v3256_v32  ;;  %2851 = vmatprep.subr.bf16.mxu0 %v2850_v39 }
  0xce   :  { %2586 = vmatprep.mubr.f32.mxu1 %v338_v35  ;;  %v214_v35 = vld [vmem:[%s3812_s2 + $0x18] sm:$0xff] }
  0xcf   :  { %2587 = vmatmul.mubr.f32.gmra.mrb[6].mxu1 %v339_v21  ;;  %v647_v21 = vld [vmem:[%s3814_s4 + $0x50] sm:$0xff] }
  0xd0   :  { %2853 = vmatpush3.bf16.msra.mxu0 %v2850_v39  ;;  %v2866_v36 = vpack.c.bf16 %v648_v23, %v647_v21 }
  0xd1   :  { %2855 = vmatprep.subr.bf16.mxu0 %v2854_v42 }
  0xd4   :  { %2857 = vmatpush3.bf16.msra.mxu0 %v2854_v42 }
  0xd5   :  { %2859 = vmatprep.subr.bf16.mxu0 %v2858_v45 }
  0xd8   :  { %2861 = vmatpush3.bf16.msra.mxu0 %v2858_v45 }
  0xd9   :  { %2863 = vmatprep.subr.bf16.mxu0 %v2862_v29 }
  0xdc   :  { %2865 = vmatpush3.bf16.msra.mxu0 %v2862_v29 }
  0xdd   :  { %2867 = vmatprep.subr.bf16.mxu0 %v2866_v36 }
  0xe0   :  { %2869 = vmatpush3.bf16.msra.mxu0 %v2866_v36 }
 0x172   :  { %v2535_v47 = vpop.f32.mrb[0].mxu0 }
 0x173   :  { %v446_v48 = vmul.f32 0.0078125, %v2535_v47  ;;  %v293_v49 = vpop.f32.mrb[1].mxu0  ;;  %v219_v47 = vld [vmem:[%s3813_s3] sm:$0xff] }
 0x174   :  { %v445_v50 = vmul.f32 0.0078125, %v293_v49  ;;  %v2579_v51 = vpop.f32.mrb[0].mxu1  ;;  %v649_v49 = vld [vmem:[%s3814_s4 + $0x60] sm:$0xff] }
 0x175   :  { %v462_v52 = vmul.f32 %v446_v48, %v446_v48  ;;  %v454_v53 = vmul.f32 0.0078125, %v2579_v51  ;;  %v406_v54 = vpop.f32.mrb[1].mxu1 }
 0x176   :  { %v461_v55 = vmul.f32 %v445_v50, %v445_v50  ;;  %v453_v56 = vmul.f32 0.0078125, %v406_v54 }
 0x177   :  { %v470_v59 = vsub.f32 %v454_v53, %v462_v52 }
 0x178   :  { %v469_v60 = vsub.f32 %v453_v56, %v461_v55 }
 0x179   :  { %v478_v61 = vadd.f32 1e-05, %v470_v59 }
 0x17a   :  { %v477_v62 = vadd.f32 1e-05, %v469_v60  ;;  %v2538_v63 = vpop.f32.mrb[2].mxu0 }
 0x17b   :  { %2964 = vrsqrt.f32 %v478_v61  ;;  %v448_v0 = vmul.f32 0.0078125, %v2538_v63  ;;  %v303_v1 = vpop.f32.mrb[3].mxu0  ;;  %v222_v63 = vld [vmem:[%s3813_s3 + $0x18] sm:$0xff] }
 0x17c   :  { %2966 = vrsqrt.f32 %v477_v62  ;;  %v447_v2 = vmul.f32 0.0078125, %v303_v1  ;;  %v2582_v3 = vpop.f32.mrb[2].mxu1 }
 0x17d   :  { %v464_v4 = vmul.f32 %v448_v0, %v448_v0  ;;  %v456_v5 = vmul.f32 0.0078125, %v2582_v3  ;;  %v416_v7 = vpop.f32.mrb[3].mxu1  ;;  %v221_v3 = vld [vmem:[%s3813_s3 + $0x10] sm:$0xff] }
 0x17e   :  { %v463_v8 = vmul.f32 %v447_v2, %v447_v2  ;;  %v455_v9 = vmul.f32 0.0078125, %v416_v7 }
 0x17f   :  { %v472_v10 = vsub.f32 %v456_v5, %v464_v4 }
 0x180   :  { %v471_v13 = vsub.f32 %v455_v9, %v463_v8 }
 0x181   :  { %v480_v14 = vadd.f32 1e-05, %v472_v10  ;;  %v216_v10 = vld [vmem:[%s3812_s2 + $0x28] sm:$0xff] }
 0x182   :  { %v479_v15 = vadd.f32 1e-05, %v471_v13  ;;  %v215_v13 = vld [vmem:[%s3812_s2 + $0x20] sm:$0xff] }
 0x183   :  { %2968 = vrsqrt.f32 %v480_v14 }
 0x184   :  { %2970 = vrsqrt.f32 %v479_v15 }
 0x185   :  { %v2965_v19 = vpop.eup %2964 }
 0x186   :  { %v2967_v20 = vpop.eup %2966  ;;  %v494_v22 = vmul.f32 %v2965_v19, %v212_v16 }
 0x187   :  { %v493_v24 = vmul.f32 %v2967_v20, %v211_v18 }
 0x188   :  { %524 = vperm.xlu1 %2962, %v494_v22   ;;  %v502_v27 = vmul.f32 %v494_v22, %v446_v48 }
 0x189   :  { %v501_v30 = vmul.f32 %v493_v24, %v445_v50  ;;  %v650_v50 = vld [vmem:[%s3814_s4 + $0x68] sm:$0xff] }
 0x18a   :  { %v510_v42 = vsub.f32 %v220_v31, %v502_v27  ;;  %v2870_v55 = vpack.c.bf16 %v650_v50, %v649_v49  ;;  %v226_v49 = vld [vmem:[%s3813_s3 + $0x38] sm:$0xff] }
 0x18b   :  { %v509_v62 = vsub.f32 %v219_v47, %v501_v30 }
 0x18c   :  { %519 = vperm.xlu1 %2962, %v493_v24   ;;  %2871 = vmatprep.subr.bf16.mxu0 %v2870_v55 }
 0x18d   :  { %v2969_v37 = vpop.eup %2968  ;;  %v2541_v38 = vpop.f32.mrb[4].mxu0  ;;  %2873 = vmatpush3.bf16.msra.mxu0 %v2870_v55 }
 0x18e   :  { %v2971_v39 = vpop.eup %2970  ;;  %v450_v40 = vmul.f32 0.0078125, %v2541_v38  ;;  %v313_v41 = vpop.f32.mrb[5].mxu0  ;;  %v496_v43 = vmul.f32 %v2969_v37, %v214_v35  ;;  %v223_v35 = vld [vmem:[%s3813_s3 + $0x20] sm:$0xff] }
 0x18f   :  { %v449_v44 = vmul.f32 0.0078125, %v313_v41  ;;  %v2585_v45 = vpop.f32.mrb[4].mxu1  ;;  %v495_v48 = vmul.f32 %v2971_v39, %v213_v28 }
 0x190   :  { %v466_v51 = vmul.f32 %v450_v40, %v450_v40  ;;  %v458_v52 = vmul.f32 0.0078125, %v2585_v45  ;;  %v426_v53 = vpop.f32.mrb[5].mxu1  ;;  %572 = vperm.xlu1 %2962, %v510_v42   ;;  %534 = vperm.xlu0 %2963, %v496_v43   ;;  %v504_v54 = vmul.f32 %v496_v43, %v448_v0  ;;  %v651_v0 = vld [vmem:[%s3814_s4 + $0x70] sm:$0xff] }
 0x191   :  { %v465_v56 = vmul.f32 %v449_v44, %v449_v44  ;;  %v457_v59 = vmul.f32 0.0078125, %v426_v53  ;;  %v503_v60 = vmul.f32 %v495_v48, %v447_v2  ;;  %v652_v2 = vld [vmem:[%s3814_s4 + $0x78] sm:$0xff]  ;;  %v217_v43 = vld [vmem:[%s3812_s2 + $0x30] sm:$0xff] }
 0x192   :  { %v474_v61 = vsub.f32 %v458_v52, %v466_v51  ;;  %v2874_v5 = vpack.c.bf16 %v652_v2, %v651_v0  ;;  %v512_v8 = vsub.f32 %v222_v63, %v504_v54  ;;  %v225_v51 = vld [vmem:[%s3813_s3 + $0x30] sm:$0xff] }
 0x193   :  { %v473_v1 = vsub.f32 %v457_v59, %v465_v56  ;;  %v511_v9 = vsub.f32 %v221_v3, %v503_v60 }
 0x194   :  { %v482_v4 = vadd.f32 1e-05, %v474_v61  ;;  %567 = vperm.xlu0 %2963, %v509_v62   ;;  %529 = vperm.xlu1 %2962, %v495_v48  }
 0x195   :  { %v481_v7 = vadd.f32 1e-05, %v473_v1  ;;  %2875 = vmatprep.subr.bf16.mxu0 %v2874_v5 }
 0x196   :  { %2972 = vrsqrt.f32 %v482_v4  ;;  %2877 = vmatpush3.bf16.msra.mxu0 %v2874_v5 }
 0x197   :  { %2974 = vrsqrt.f32 %v481_v7  ;;  %2894 = vmatprep.subr.bf16.mxu0 %v3044_v6 }
 0x198   :  { %582 = vperm.xlu0 %2963, %v512_v8   ;;  %577 = vperm.xlu1 %2962, %v511_v9  }
 0x1a0   :  { %v2973_v14 = vpop.eup %2972  ;;  %v2544_v15 = vpop.f32.mrb[6].mxu0 }
 0x1a1   :  { %v2975_v16 = vpop.eup %2974  ;;  %v452_v18 = vmul.f32 0.0078125, %v2544_v15  ;;  %v323_v19 = vpop.f32.mrb[7].mxu0  ;;  %v498_v20 = vmul.f32 %v2973_v14, %v216_v10 }
 0x1a2   :  { %v451_v22 = vmul.f32 0.0078125, %v323_v19  ;;  %v2588_v24 = vpop.f32.mrb[6].mxu1  ;;  %v497_v25 = vmul.f32 %v2975_v16, %v215_v13 }
 0x1a3   :  { %v468_v27 = vmul.f32 %v452_v18, %v452_v18  ;;  %v460_v29 = vmul.f32 0.0078125, %v2588_v24  ;;  %v436_v30 = vpop.f32.mrb[7].mxu1  ;;  %544 = vperm.xlu0 %2963, %v498_v20   ;;  %v506_v31 = vmul.f32 %v498_v20, %v450_v40  ;;  %v218_v40 = vld [vmem:[%s3812_s2 + $0x38] sm:$0xff] }
 0x1a4   :  { %v467_v21 = vmul.f32 %v451_v22, %v451_v22  ;;  %v459_v23 = vmul.f32 0.0078125, %v436_v30  ;;  %539 = vperm.xlu1 %2962, %v497_v25   ;;  %v505_v28 = vmul.f32 %v497_v25, %v449_v44 }
 0x1a5   :  { %v476_v36 = vsub.f32 %v460_v29, %v468_v27  ;;  %v514_v37 = vsub.f32 %v224_v26, %v506_v31 }
 0x1a6   :  { %v475_v38 = vsub.f32 %v459_v23, %v467_v21  ;;  %v513_v39 = vsub.f32 %v223_v35, %v505_v28 }
 0x1a7   :  { %v484_v41 = vadd.f32 1e-05, %v476_v36  ;;  %592 = vperm.xlu0 %2963, %v514_v37  }
 0x1a8   :  { %v483_v42 = vadd.f32 1e-05, %v475_v38  ;;  %587 = vperm.xlu1 %2962, %v513_v39  }
 0x1a9   :  { %2976 = vrsqrt.f32 %v484_v41 }
 0x1aa   :  { %2978 = vrsqrt.f32 %v483_v42 }
 0x1b3   :  { %v2977_v45 = vpop.eup %2976 }
 0x1b4   :  { %v2979_v44 = vpop.eup %2978  ;;  %v500_v47 = vmul.f32 %v2977_v45, %v218_v40  ;;  %v758_v40 = vld [vmem:[%s3815_s5] sm:$0xff] }
 0x1b5   :  { %v499_v48 = vmul.f32 %v2979_v44, %v217_v43  ;;  %2649 = vmatprep.mubr.msk.f32.mxu1 %vm774_vm8, %v758_v40 }
 0x1b6   :  { %554 = vperm.xlu0 %2963, %v500_v47   ;;  %v508_v50 = vmul.f32 %v500_v47, %v452_v18 }
 0x1b7   :  { %549 = vperm.xlu1 %2962, %v499_v48   ;;  %v507_v52 = vmul.f32 %v499_v48, %v451_v22 }
 0x1b8   :  { %v516_v53 = vsub.f32 %v226_v49, %v508_v50 }
 0x1b9   :  { %v515_v54 = vsub.f32 %v225_v51, %v507_v52 }
 0x1ba   :  { %602 = vperm.xlu0 %2963, %v516_v53  }
 0x1bb   :  { %597 = vperm.xlu1 %2962, %v515_v54   ;;  %v759_v54 = vld [vmem:[%s3815_s5 + $0x8] sm:$0xff] }
 0x207   :  { %v525_v55 = vpop.permute.xlu1 %524 }
 0x208   :  { %v558_v59 = vmul.f32 %v525_v55, %v3214_v46  ;;  %v760_v55 = vld [vmem:[%s3815_s5 + $0x10] sm:$0xff] }
 0x20b   :  { %v520_v56 = vpop.permute.xlu1 %519 }
 0x20c   :  { %v557_v63 = vmul.f32 %v520_v56, %v3205_v33  ;;  %v761_v56 = vld [vmem:[%s3815_s5 + $0x18] sm:$0xff] }
 0x20f   :  { %v573_v60 = vpop.permute.xlu1 %572  ;;  %v535_v61 = vpop.permute.xlu0 %534 }
 0x210   :  { %v606_v62 = vadd.f32 %v573_v60, %v558_v59  ;;  %v560_v4 = vmul.f32 %v535_v61, %v3224_v57  ;;  %v762_v59 = vld [vmem:[%s3815_s5 + $0x20] sm:$0xff]  ;;  %v763_v60 = vld [vmem:[%s3815_s5 + $0x28] sm:$0xff]  ;;  %v764_v61 = vld [vmem:[%s3815_s5 + $0x30] sm:$0xff] }
 0x212   :  { %v622_v2 = vmul.f32 0.2, %v606_v62  ;;  %vm614_vm0 = vcmp.gt.f32.partialorder %v606_v62, 0.0 }
 0x213   :  { %v568_v1 = vpop.permute.xlu0 %567  ;;  %v530_v3 = vpop.permute.xlu1 %529 }
 0x214   :  { %v605_v0 = vadd.f32 %v568_v1, %v557_v63  ;;  %v559_v7 = vmul.f32 %v530_v3, %v3226_v58  ;;  %v630_v14 = vsel %vm614_vm0, %v606_v62, %v622_v2  ;;  %v765_v62 = vld [vmem:[%s3815_s5 + $0x38] sm:$0xff]  ;;  %v766_v63 = vld [vmem:[%s3815_s5 + $0x40] sm:$0xff]  ;;  %v767_v1 = vld [vmem:[%s3815_s5 + $0x48] sm:$0xff] }
 0x215   :  { %v768_v3 = vld [vmem:[%s3815_s5 + $0x50] sm:$0xff]  ;;  %v770_v2 = vld [vmem:[%s3815_s5 + $0x60] sm:$0xff] }
 0x216   :  { %v621_v5 = vmul.f32 0.2, %v605_v0  ;;  %vm613_vm1 = vcmp.gt.f32.partialorder %v605_v0, 0.0 }
 0x217   :  { %v583_v8 = vpop.permute.xlu0 %582  ;;  %v578_v9 = vpop.permute.xlu1 %577 }
 0x218   :  { %v608_v10 = vadd.f32 %v583_v8, %v560_v4  ;;  %v607_v46 = vadd.f32 %v578_v9, %v559_v7  ;;  %v629_v13 = vsel %vm613_vm1, %v605_v0, %v621_v5  ;;  %v769_v0 = vld [vmem:[%s3815_s5 + $0x58] sm:$0xff]  ;;  %v771_v4 = vld [vmem:[%s3815_s5 + $0x68] sm:$0xff]  ;;  %v772_v5 = vld [vmem:[%s3815_s5 + $0x70] sm:$0xff] }
 0x219   :  { %2621 = vmatprep.mubr.f32.mxu0 %v629_v13  ;;  %v773_v7 = vld [vmem:[%s3815_s5 + $0x78] sm:$0xff] }
 0x21a   :  { %v624_v15 = vmul.f32 0.2, %v608_v10  ;;  %v623_v33 = vmul.f32 0.2, %v607_v46  ;;  %2622 = vmatmul.mubr.f32.vlgmr.msra.gmra.mrb[8].mxu0 %v630_v14  ;;  %vm615_vm2 = vcmp.gt.f32.partialorder %v607_v46, 0.0  ;;  %vm616_vm3 = vcmp.gt.f32.partialorder %v608_v10, 0.0 }
 0x21b   :  { %2895 = vmatpush3.bf16.msra.mxu0 %v3044_v6 }
 0x21c   :  { %v631_v57 = vsel %vm615_vm2, %v607_v46, %v623_v33  ;;  %v632_v16 = vsel %vm616_vm3, %v608_v10, %v624_v15  ;;  %2896 = vmatprep.subr.bf16.mxu0 %v3044_v6 }
 0x21d   :  { %2624 = vmatprep.mubr.f32.mxu0 %v631_v57 }
 0x21e   :  { %2625 = vmatmul.mubr.f32.gmra.mrb[10].mxu0 %v632_v16 }
 0x21f   :  { %2897 = vmatpush3.bf16.msra.mxu0 %v3044_v6 }
 0x222   :  { %v545_v58 = vpop.permute.xlu0 %544 }
 0x223   :  { %v540_v18 = vpop.permute.xlu1 %539  ;;  %v562_v19 = vmul.f32 %v545_v58, %v3240_v11 }
 0x224   :  { %v561_v20 = vmul.f32 %v540_v18, %v3242_v12 }
 0x226   :  { %v593_v22 = vpop.permute.xlu0 %592 }
 0x227   :  { %v610_v24 = vadd.f32 %v593_v22, %v562_v19  ;;  %v588_v25 = vpop.permute.xlu1 %587 }
 0x228   :  { %v609_v26 = vadd.f32 %v588_v25, %v561_v20 }
 0x229   :  { %v626_v27 = vmul.f32 0.2, %v610_v24  ;;  %vm618_vm5 = vcmp.gt.f32.partialorder %v610_v24, 0.0 }
 0x22a   :  { %v625_v29 = vmul.f32 0.2, %v609_v26  ;;  %vm617_vm4 = vcmp.gt.f32.partialorder %v609_v26, 0.0 }
 0x22b   :  { %v634_v31 = vsel %vm618_vm5, %v610_v24, %v626_v27 }
 0x22c   :  { %v633_v30 = vsel %vm617_vm4, %v609_v26, %v625_v29 }
 0x22d   :  { %2627 = vmatprep.mubr.f32.mxu0 %v633_v30 }
 0x22e   :  { %2628 = vmatmul.mubr.f32.gmra.mrb[12].mxu0 %v634_v31 }
 0x235   :  { %v555_v35 = vpop.permute.xlu0 %554 }
 0x236   :  { %v550_v21 = vpop.permute.xlu1 %549  ;;  %v564_v23 = vmul.f32 %v555_v35, %v3256_v32 }
 0x237   :  { %v563_v11 = vmul.f32 %v550_v21, %v3258_v34 }
 0x239   :  { %v603_v28 = vpop.permute.xlu0 %602 }
 0x23a   :  { %v612_v12 = vadd.f32 %v603_v28, %v564_v23  ;;  %v598_v36 = vpop.permute.xlu1 %597 }
 0x23b   :  { %v611_v37 = vadd.f32 %v598_v36, %v563_v11 }
 0x23c   :  { %v628_v38 = vmul.f32 0.2, %v612_v12  ;;  %vm620_vm7 = vcmp.gt.f32.partialorder %v612_v12, 0.0 }
 0x23d   :  { %v627_v39 = vmul.f32 0.2, %v611_v37  ;;  %vm619_vm6 = vcmp.gt.f32.partialorder %v611_v37, 0.0 }
 0x23e   :  { %v636_v42 = vsel %vm620_vm7, %v612_v12, %v628_v38 }
 0x23f   :  { %v635_v41 = vsel %vm619_vm6, %v611_v37, %v627_v39 }
 0x240   :  { %2630 = vmatprep.mubr.f32.mxu0 %v635_v41 }
 0x241   :  { %2631 = vmatmul.mubr.f32.gmra.mrb[14].mxu0 %v636_v42 }
 0x2ed   :  { %v2623_v32 = vpop.f32.mrb[8].mxu0 }
 0x2ee   :  { %v719_v34 = vpop.f32.mrb[9].mxu0 }
 0x2ef   :  { %v2878_v43 = vpack.c.bf16 %v2623_v32, %v719_v34 }
 0x2f1   :  { %v2626_v45 = vpop.f32.mrb[10].mxu0  ;;  %2879 = vmatprep.subr.bf16.mxu1 %v2878_v43 }
 0x2f2   :  { %v729_v44 = vpop.f32.mrb[11].mxu0  ;;  %2881 = vmatpush3.bf16.msra.mxu1 %v2878_v43 }
 0x2f3   :  { %v2882_v47 = vpack.c.bf16 %v2626_v45, %v729_v44 }
 0x2f5   :  { %2883 = vmatprep.subr.bf16.mxu1 %v2882_v47 }
 0x2f6   :  { %2885 = vmatpush3.bf16.msra.mxu1 %v2882_v47 }
 0x301   :  { %v2629_v48 = vpop.f32.mrb[12].mxu0 }
 0x302   :  { %v739_v49 = vpop.f32.mrb[13].mxu0 }
 0x303   :  { %v2886_v50 = vpack.c.bf16 %v2629_v48, %v739_v49 }
 0x305   :  { %2887 = vmatprep.subr.bf16.mxu1 %v2886_v50 }
 0x306   :  { %2889 = vmatpush3.bf16.msra.mxu1 %v2886_v50 }
 0x314   :  { %v2632_v51 = vpop.f32.mrb[14].mxu0 }
 0x315   :  { %v749_v52 = vpop.f32.mrb[15].mxu0 }
 0x316   :  { %v2890_v53 = vpack.c.bf16 %v2632_v51, %v749_v52 }
 0x318   :  { %2891 = vmatprep.subr.bf16.mxu1 %v2890_v53 }
 0x319   :  { %2893 = vmatpush3.bf16.msra.mxu1 %v2890_v53 }
 0x31a   :  { %2934 = vmatprep.subr.bf16.mxu1 %v3044_v6 }
 0x31c   :  { %2650 = vmatmul.mubr.msk.f32.vlgmr.msra.gmra.mrb[8].mxu1 %vm774_vm8, %v759_v54 }
 0x31d   :  { %2652 = vmatprep.mubr.msk.f32.mxu1 %vm774_vm8, %v760_v55  ;;  %2936 = vmatpush3.bf16.msra.mxu1 %v3044_v6 }
 0x31e   :  { %2935 = vmatprep.subr.bf16.mxu1 %v3044_v6 }
 0x320   :  { %2653 = vmatmul.mubr.msk.f32.gmra.mrb[10].mxu1 %vm774_vm8, %v761_v56 }
 0x321   :  { %2655 = vmatprep.mubr.msk.f32.mxu1 %vm774_vm8, %v762_v59  ;;  %2937 = vmatpush3.bf16.msra.mxu1 %v3044_v6 }
 0x322   :  { %2898 = vmatprep.subr.bf16.mxu1 %v3044_v6 }
 0x324   :  { %2656 = vmatmul.mubr.msk.f32.gmra.mrb[12].mxu1 %vm774_vm8, %v763_v60 }
 0x325   :  { %2658 = vmatprep.mubr.msk.f32.mxu1 %vm774_vm8, %v764_v61 }
 0x328   :  { %2659 = vmatmul.mubr.msk.f32.gmra.mrb[14].mxu1 %vm774_vm8, %v765_v62 }
 0x329   :  { %2661 = vmatprep.mubr.msk.f32.mxu1 %vm774_vm8, %v766_v63 }
 0x32c   :  { %2662 = vmatmul.mubr.msk.f32.gmra.mrb[16].mxu1 %vm774_vm8, %v767_v1 }
 0x32d   :  { %2664 = vmatprep.mubr.msk.f32.mxu1 %vm774_vm8, %v768_v3 }
 0x330   :  { %2665 = vmatmul.mubr.msk.f32.gmra.mrb[18].mxu1 %vm774_vm8, %v769_v0 }
 0x331   :  { %2667 = vmatprep.mubr.msk.f32.mxu1 %vm774_vm8, %v770_v2 }
 0x334   :  { %2668 = vmatmul.mubr.msk.f32.gmra.mrb[20].mxu1 %vm774_vm8, %v771_v4 }
 0x335   :  { %2670 = vmatprep.mubr.msk.f32.mxu1 %vm774_vm8, %v772_v5 }
 0x338   :  { %2671 = vmatmul.mubr.msk.f32.gmra.mrb[22].mxu1 %vm774_vm8, %v773_v7 }
 0x3ef   :  { %v3443_v8 = vpop.f32.mrb[8].mxu1 }
 0x3f0   :  { %v3445_v9 = vpop.f32.mrb[9].mxu1  ;;  %v1195_v26 = vmul.f32 %v3443_v8, %v3443_v8 }
 0x3f1   :  { %2681 = vmatprep.mubr.msk.f32.mxu0 %vm1000_vm9, %v3445_v9  ;;  %v1194_v25 = vmul.f32 %v3445_v9, %v3445_v9 }
 0x3f2   :  { %2682 = vmatmul.mubr.msk.f32.vlgmr.msra.gmra.mrb[16].mxu0 %vm1000_vm9, %v3443_v8 }
 0x3f3   :  { %v3451_v10 = vpop.f32.mrb[10].mxu1 }
 0x3f4   :  { %v3453_v46 = vpop.f32.mrb[11].mxu1  ;;  %v1197_v29 = vmul.f32 %v3451_v10, %v3451_v10 }
 0x3f5   :  { %2684 = vmatprep.mubr.msk.f32.mxu0 %vm1000_vm9, %v3453_v46  ;;  %v1196_v27 = vmul.f32 %v3453_v46, %v3453_v46 }
 0x3f6   :  { %2685 = vmatmul.mubr.msk.f32.gmra.mrb[18].mxu0 %vm1000_vm9, %v3451_v10 }
 0x3f7   :  { %v3459_v13 = vpop.f32.mrb[12].mxu1 }
 0x3f8   :  { %v3461_v14 = vpop.f32.mrb[13].mxu1 }
 0x3f9   :  { %2687 = vmatprep.mubr.msk.f32.mxu0 %vm1000_vm9, %v3461_v14  ;;  %v1198_v30 = vmul.f32 %v3461_v14, %v3461_v14 }
 0x3fa   :  { %2688 = vmatmul.mubr.msk.f32.gmra.mrb[20].mxu0 %vm1000_vm9, %v3459_v13 }
 0x3fb   :  { %v3467_v15 = vpop.f32.mrb[14].mxu1 }
 0x3fc   :  { %v3469_v33 = vpop.f32.mrb[15].mxu1  ;;  %v1201_v35 = vmul.f32 %v3467_v15, %v3467_v15 }
 0x3fd   :  { %2690 = vmatprep.mubr.msk.f32.mxu0 %vm1000_vm9, %v3469_v33  ;;  %v1200_v31 = vmul.f32 %v3469_v33, %v3469_v33 }
 0x3fe   :  { %2691 = vmatmul.mubr.msk.f32.gmra.mrb[22].mxu0 %vm1000_vm9, %v3467_v15 }
 0x3ff   :  { %v3475_v57 = vpop.f32.mrb[16].mxu1 }
 0x400   :  { %v3477_v16 = vpop.f32.mrb[17].mxu1  ;;  %v1203_v23 = vmul.f32 %v3475_v57, %v3475_v57 }
 0x401   :  { %2693 = vmatprep.mubr.msk.f32.mxu0 %vm1000_vm9, %v3477_v16  ;;  %v1202_v21 = vmul.f32 %v3477_v16, %v3477_v16 }
 0x402   :  { %2694 = vmatmul.mubr.msk.f32.gmra.mrb[24].mxu0 %vm1000_vm9, %v3475_v57 }
 0x403   :  { %v3483_v58 = vpop.f32.mrb[18].mxu1 }
 0x404   :  { %v3485_v18 = vpop.f32.mrb[19].mxu1  ;;  %v1205_v28 = vmul.f32 %v3483_v58, %v3483_v58 }
 0x405   :  { %2696 = vmatprep.mubr.msk.f32.mxu0 %vm1000_vm9, %v3485_v18  ;;  %v1204_v11 = vmul.f32 %v3485_v18, %v3485_v18 }
 0x406   :  { %2697 = vmatmul.mubr.msk.f32.gmra.mrb[26].mxu0 %vm1000_vm9, %v3483_v58 }
 0x407   :  { %v3491_v19 = vpop.f32.mrb[20].mxu1 }
 0x408   :  { %v3493_v20 = vpop.f32.mrb[21].mxu1  ;;  %v1207_v36 = vmul.f32 %v3491_v19, %v3491_v19 }
 0x409   :  { %2699 = vmatprep.mubr.msk.f32.mxu1 %vm1000_vm9, %v3493_v20  ;;  %v1206_v12 = vmul.f32 %v3493_v20, %v3493_v20 }
 0x40a   :  { %2700 = vmatmul.mubr.msk.f32.vlgmr.msra.gmra.mrb[24].mxu1 %vm1000_vm9, %v3491_v19 }
 0x40b   :  { %v3499_v22 = vpop.f32.mrb[22].mxu1  ;;  %2899 = vmatpush3.bf16.msra.mxu1 %v3044_v6 }
 0x40c   :  { %v3502_v24 = vpop.f32.mrb[23].mxu1  ;;  %2900 = vmatprep.subr.bf16.mxu1 %v3044_v6  ;;  %v1209_v38 = vmul.f32 %v3499_v22, %v3499_v22 }
 0x40d   :  { %2702 = vmatprep.mubr.msk.f32.mxu1 %vm1000_vm9, %v3502_v24  ;;  %v1208_v37 = vmul.f32 %v3502_v24, %v3502_v24 }
 0x40e   :  { %2703 = vmatmul.mubr.msk.f32.gmra.mrb[26].mxu1 %vm1000_vm9, %v3499_v22 }
 0x40f   :  { %2901 = vmatpush3.bf16.msra.mxu1 %v3044_v6  ;;  %2713 = vmatprep.mubr.msk.f32.mxu1 %vm1000_vm9, %v1194_v25  ;;  %v1199_v6 = vmul.f32 %v3459_v13, %v3459_v13 }
 0x412   :  { %2714 = vmatmul.mubr.msk.f32.vlgmr.msra.gmra.mrb[28].mxu1 %vm1000_vm9, %v1195_v26 }
 0x413   :  { %2716 = vmatprep.mubr.msk.f32.mxu1 %vm1000_vm9, %v1196_v27 }
 0x416   :  { %2717 = vmatmul.mubr.msk.f32.gmra.mrb[30].mxu1 %vm1000_vm9, %v1197_v29 }
 0x417   :  { %2719 = vmatprep.mubr.msk.f32.mxu1 %vm1000_vm9, %v1198_v30 }
 0x41a   :  { %2720 = vmatmul.mubr.msk.f32.gmra.mrb[32].mxu1 %vm1000_vm9, %v1199_v6 }
 0x41b   :  { %2722 = vmatprep.mubr.msk.f32.mxu1 %vm1000_vm9, %v1200_v31 }
 0x41e   :  { %2723 = vmatmul.mubr.msk.f32.gmra.mrb[34].mxu1 %vm1000_vm9, %v1201_v35 }
 0x41f   :  { %2725 = vmatprep.mubr.msk.f32.mxu1 %vm1000_vm9, %v1202_v21 }
 0x422   :  { %2726 = vmatmul.mubr.msk.f32.gmra.mrb[36].mxu1 %vm1000_vm9, %v1203_v23 }
 0x423   :  { %2728 = vmatprep.mubr.msk.f32.mxu1 %vm1000_vm9, %v1204_v11 }
 0x426   :  { %2729 = vmatmul.mubr.msk.f32.gmra.mrb[38].mxu1 %vm1000_vm9, %v1205_v28 }
 0x427   :  { %2731 = vmatprep.mubr.msk.f32.mxu1 %vm1000_vm9, %v1206_v12 }
 0x42a   :  { %2732 = vmatmul.mubr.msk.f32.gmra.mrb[40].mxu1 %vm1000_vm9, %v1207_v36 }
 0x42b   :  { %2734 = vmatprep.mubr.msk.f32.mxu1 %vm1000_vm9, %v1208_v37 }
 0x42e   :  { %2735 = vmatmul.mubr.msk.f32.gmra.mrb[42].mxu1 %vm1000_vm9, %v1209_v38 }
 0x4c5   :  { %v2683_v39 = vpop.f32.mrb[16].mxu0 }
 0x4c6   :  { %v1115_v41 = vpop.f32.mrb[17].mxu0  ;;  %v3562_v53 = vmul.f32 0.03125, %v2683_v39 }
 0x4c7   :  { %v3566_v55 = vmul.f32 0.03125, %v1115_v41 }
 0x4c8   :  { %v1436_v59 = vmul.f32 %v3562_v53, %v3562_v53 }
 0x4c9   :  { %v2686_v42 = vpop.f32.mrb[18].mxu0  ;;  %v1435_v63 = vmul.f32 %v3566_v55, %v3566_v55 }
 0x4ca   :  { %v1125_v40 = vpop.f32.mrb[19].mxu0  ;;  %v3570_v60 = vmul.f32 0.03125, %v2686_v42 }
 0x4cb   :  { %v3574_v1 = vmul.f32 0.03125, %v1125_v40 }
 0x4cc   :  { %v1438_v5 = vmul.f32 %v3570_v60, %v3570_v60 }
 0x4cd   :  { %v2689_v32 = vpop.f32.mrb[20].mxu0  ;;  %v1437_v29 = vmul.f32 %v3574_v1, %v3574_v1 }
 0x4ce   :  { %v1135_v34 = vpop.f32.mrb[21].mxu0  ;;  %v3578_v7 = vmul.f32 0.03125, %v2689_v32 }
 0x4cf   :  { %v3582_v30 = vmul.f32 0.03125, %v1135_v34 }
 0x4d0   :  { %v1440_v28 = vmul.f32 %v3578_v7, %v3578_v7 }
 0x4d1   :  { %v2692_v43 = vpop.f32.mrb[22].mxu0  ;;  %v1439_v38 = vmul.f32 %v3582_v30, %v3582_v30 }
 0x4d2   :  { %v1145_v45 = vpop.f32.mrb[23].mxu0  ;;  %v3584_v35 = vmul.f32 0.03125, %v2692_v43 }
 0x4d3   :  { %v3590_v39 = vmul.f32 0.03125, %v1145_v45 }
 0x4d4   :  { %v1442_v40 = vmul.f32 %v3584_v35, %v3584_v35 }
 0x4d5   :  { %v2695_v44 = vpop.f32.mrb[24].mxu0 }
 0x4d6   :  { %v1155_v47 = vpop.f32.mrb[25].mxu0  ;;  %v3594_v34 = vmul.f32 0.03125, %v2695_v44 }
 0x4d7   :  { %v3596_v43 = vmul.f32 0.03125, %v1155_v47  ;;  %v969_v47 = vld [vmem:[%s3816_s6 + $0x8] sm:$0xff] }
 0x4d9   :  { %v2698_v48 = vpop.f32.mrb[26].mxu0 }
 0x4da   :  { %v1165_v49 = vpop.f32.mrb[27].mxu0 }
 0x4dd   :  { %v2701_v50 = vpop.f32.mrb[24].mxu1 }
 0x4de   :  { %v3558_v51 = vpop.f32.mrb[25].mxu1 }
 0x4e1   :  { %v3560_v52 = vpop.f32.mrb[26].mxu1 }
 0x4e2   :  { %v3564_v54 = vpop.f32.mrb[27].mxu1 }
 0x4e5   :  { %v2715_v56 = vpop.f32.mrb[28].mxu1 }
 0x4e6   :  { %v1420_v61 = vmul.f32 0.03125, %v2715_v56  ;;  %v1324_v62 = vpop.f32.mrb[29].mxu1 }
 0x4e7   :  { %v1419_v3 = vmul.f32 0.03125, %v1324_v62  ;;  %v3600_v62 = vmul.f32 0.03125, %v1165_v49  ;;  %v1443_v49 = vmul.f32 %v3596_v43, %v3596_v43 }
 0x4e8   :  { %v1452_v0 = vsub.f32 %v1420_v61, %v1436_v59  ;;  %v3598_v61 = vmul.f32 0.03125, %v2698_v48  ;;  %v1444_v48 = vmul.f32 %v3594_v34, %v3594_v34 }
 0x4e9   :  { %v1451_v2 = vsub.f32 %v1419_v3, %v1435_v63  ;;  %v2718_v4 = vpop.f32.mrb[30].mxu1 }
 0x4ea   :  { %v1468_v25 = vadd.f32 1e-05, %v1452_v0  ;;  %v1422_v26 = vmul.f32 0.03125, %v2718_v4  ;;  %v1334_v27 = vpop.f32.mrb[31].mxu1  ;;  %v1441_v0 = vmul.f32 %v3590_v39, %v3590_v39 }
 0x4eb   :  { %v1467_v6 = vadd.f32 1e-05, %v1451_v2  ;;  %v1421_v31 = vmul.f32 0.03125, %v1334_v27 }
 0x4ec   :  { %2980 = vrsqrt.f32 %v1468_v25  ;;  %v1454_v21 = vsub.f32 %v1422_v26, %v1438_v5  ;;  %v3604_v5 = vmul.f32 0.03125, %v2701_v50  ;;  %v968_v50 = vld [vmem:[%s3816_s6] sm:$0xff] }
 0x4ed   :  { %2982 = vrsqrt.f32 %v1467_v6  ;;  %v1453_v23 = vsub.f32 %v1421_v31, %v1437_v29  ;;  %v2721_v11 = vpop.f32.mrb[32].mxu1  ;;  %v1446_v29 = vmul.f32 %v3598_v61, %v3598_v61  ;;  %v1445_v6 = vmul.f32 %v3600_v62, %v3600_v62 }
 0x4ee   :  { %v1470_v12 = vadd.f32 1e-05, %v1454_v21  ;;  %v1424_v36 = vmul.f32 0.03125, %v2721_v11  ;;  %v1344_v37 = vpop.f32.mrb[33].mxu1 }
 0x4ef   :  { %v1469_v41 = vadd.f32 1e-05, %v1453_v23  ;;  %v1423_v42 = vmul.f32 0.03125, %v1344_v37 }
 0x4f0   :  { %2984 = vrsqrt.f32 %v1470_v12  ;;  %v1456_v32 = vsub.f32 %v1424_v36, %v1440_v28  ;;  %v3621_v28 = vmul.f32 0.03125, %v3558_v51  ;;  %v971_v51 = vld [vmem:[%s3816_s6 + $0x18] sm:$0xff] }
 0x4f1   :  { %2986 = vrsqrt.f32 %v1469_v41  ;;  %v1455_v56 = vsub.f32 %v1423_v42, %v1439_v38  ;;  %v2724_v59 = vpop.f32.mrb[34].mxu1  ;;  %v3625_v38 = vmul.f32 %v3604_v5, %v3604_v5 }
 0x4f2   :  { %v1472_v45 = vadd.f32 1e-05, %v1456_v32  ;;  %v1426_v63 = vmul.f32 0.03125, %v2724_v59  ;;  %v1354_v3 = vpop.f32.mrb[35].mxu1  ;;  %v984_v32 = vld [vmem:[%s3817_s7] sm:$0xff] }
 0x4f3   :  { %v1471_v2 = vadd.f32 1e-05, %v1455_v56  ;;  %v1425_v4 = vmul.f32 0.03125, %v1354_v3  ;;  %v3637_v56 = vmul.f32 0.03125, %v3560_v52  ;;  %v970_v3 = vld [vmem:[%s3816_s6 + $0x10] sm:$0xff] }
 0x4f4   :  { %2988 = vrsqrt.f32 %v1472_v45  ;;  %v1458_v44 = vsub.f32 %v1426_v63, %v1442_v40  ;;  %v985_v40 = vld [vmem:[%s3817_s7 + $0x8] sm:$0xff] }
 0x4f5   :  { %2990 = vrsqrt.f32 %v1471_v2  ;;  %v1457_v25 = vsub.f32 %v1425_v4, %v1441_v0  ;;  %v2727_v26 = vpop.f32.mrb[36].mxu1  ;;  %v1787_v0 = vld [vmem:[%s3818_s8] sm:$0xff]  ;;  %v1788_v2 = vld [vmem:[%s3818_s8 + $0x8] sm:$0xff] }
 0x4f6   :  { %v2981_v27 = vpop.eup %2980  ;;  %v1474_v31 = vadd.f32 1e-05, %v1458_v44  ;;  %v1428_v21 = vmul.f32 0.03125, %v2727_v26  ;;  %v1364_v23 = vpop.f32.mrb[37].mxu1 }
 0x4f7   :  { %v2983_v11 = vpop.eup %2982  ;;  %v1473_v12 = vadd.f32 1e-05, %v1457_v25  ;;  %v1427_v36 = vmul.f32 0.03125, %v1364_v23  ;;  %v1500_v37 = vmul.f32 %v2981_v27, %v969_v47 }
 0x4f8   :  { %2992 = vrsqrt.f32 %v1474_v31  ;;  %v1460_v41 = vsub.f32 %v1428_v21, %v1444_v48  ;;  %v1499_v42 = vmul.f32 %v2983_v11, %v968_v50  ;;  %v973_v11 = vld [vmem:[%s3816_s6 + $0x28] sm:$0xff] }
 0x4f9   :  { %2994 = vrsqrt.f32 %v1473_v12  ;;  %v1459_v59 = vsub.f32 %v1427_v36, %v1443_v49  ;;  %1554 = vperm.xlu0 %2963, %v1500_v37   ;;  %v2730_v45 = vpop.f32.mrb[38].mxu1  ;;  %v1516_v63 = vmul.f32 %v1500_v37, %v3562_v53  ;;  %v2902_v53 = vpack.c.bf16 %v1788_v2, %v1787_v0 }
 0x4fa   :  { %v2985_v52 = vpop.eup %2984  ;;  %v1476_v4 = vadd.f32 1e-05, %v1460_v41  ;;  %v1430_v44 = vmul.f32 0.03125, %v2730_v45  ;;  %1549 = vperm.xlu1 %2962, %v1499_v42   ;;  %v1374_v47 = vpop.f32.mrb[39].mxu1  ;;  %v1515_v48 = vmul.f32 %v1499_v42, %v3566_v55  ;;  %v3654_v12 = vmul.f32 0.03125, %v3564_v54  ;;  %v1789_v41 = vld [vmem:[%s3818_s8 + $0x10] sm:$0xff] }
 0x4fb   :  { %v2987_v49 = vpop.eup %2986  ;;  %v1475_v25 = vadd.f32 1e-05, %v1459_v59  ;;  %v1429_v26 = vmul.f32 0.03125, %v1374_v47  ;;  %v1532_v50 = vsub.f32 %v985_v40, %v1516_v63  ;;  %v1502_v27 = vmul.f32 %v2985_v52, %v971_v51  ;;  %2903 = vmatprep.subr.bf16.mxu0 %v2902_v53  ;;  %v1790_v54 = vld [vmem:[%s3818_s8 + $0x18] sm:$0xff] }
 0x4fc   :  { %2996 = vrsqrt.f32 %v1476_v4  ;;  %v1462_v31 = vsub.f32 %v1430_v44, %v1446_v29  ;;  %v1531_v21 = vsub.f32 %v984_v32, %v1515_v48  ;;  %v1501_v23 = vmul.f32 %v2987_v49, %v970_v3  ;;  %v972_v29 = vld [vmem:[%s3816_s6 + $0x20] sm:$0xff]  ;;  %2905 = vmatpush3.bf16.msra.mxu0 %v2902_v53  ;;  %v987_v52 = vld [vmem:[%s3817_s7 + $0x18] sm:$0xff]  ;;  %v974_v49 = vld [vmem:[%s3816_s6 + $0x30] sm:$0xff] }
 0x4fd   :  { %2998 = vrsqrt.f32 %v1475_v25  ;;  %v1461_v55 = vsub.f32 %v1429_v26, %v1445_v6  ;;  %1650 = vperm.xlu0 %2963, %v1532_v50   ;;  %v2733_v36 = vpop.f32.mrb[40].mxu1  ;;  %v1518_v37 = vmul.f32 %v1502_v27, %v3570_v60  ;;  %v2906_v51 = vpack.c.bf16 %v1790_v54, %v1789_v41 }
 0x4fe   :  { %v2989_v42 = vpop.eup %2988  ;;  %v1478_v40 = vadd.f32 1e-05, %v1462_v31  ;;  %v1432_v6 = vmul.f32 0.03125, %v2733_v36  ;;  %1645 = vperm.xlu1 %2962, %v1531_v21   ;;  %v1384_v32 = vpop.f32.mrb[41].mxu1  ;;  %v1517_v60 = vmul.f32 %v1501_v23, %v3574_v1  ;;  %v1447_v45 = vmul.f32 %v3621_v28, %v3621_v28  ;;  %v975_v1 = vld [vmem:[%s3816_s6 + $0x38] sm:$0xff] }
 0x4ff   :  { %v2991_v59 = vpop.eup %2990  ;;  %v1477_v63 = vadd.f32 1e-05, %v1461_v55  ;;  %v1431_v3 = vmul.f32 0.03125, %v1384_v32  ;;  %v1504_v0 = vmul.f32 %v2989_v42, %v973_v11  ;;  %2907 = vmatprep.subr.bf16.mxu0 %v2906_v51  ;;  %v1450_v44 = vmul.f32 %v3637_v56, %v3637_v56 }
 0x500   :  { %3000 = vrsqrt.f32 %v1478_v40  ;;  %v1464_v2 = vsub.f32 %v1432_v6, %v3625_v38  ;;  %v1503_v4 = vmul.f32 %v2991_v59, %v972_v29  ;;  %v986_v38 = vld [vmem:[%s3817_s7 + $0x10] sm:$0xff]  ;;  %2909 = vmatpush3.bf16.msra.mxu0 %v2906_v51  ;;  %v1449_v26 = vmul.f32 %v3654_v12, %v3654_v12  ;;  %v977_v40 = vld [vmem:[%s3816_s6 + $0x48] sm:$0xff] }
 0x501   :  { %3002 = vrsqrt.f32 %v1477_v63  ;;  %v1463_v47 = vsub.f32 %v1431_v3, %v1447_v45  ;;  %1564 = vperm.xlu0 %2963, %v1502_v27   ;;  %v2736_v48 = vpop.f32.mrb[42].mxu1  ;;  %v1520_v53 = vmul.f32 %v1504_v0, %v3578_v7  ;;  %v1534_v29 = vsub.f32 %v987_v52, %v1518_v37  ;;  %v989_v63 = vld [vmem:[%s3817_s7 + $0x28] sm:$0xff]  ;;  %v978_v52 = vld [vmem:[%s3816_s6 + $0x50] sm:$0xff] }
 0x502   :  { %v2993_v25 = vpop.eup %2992  ;;  %v1480_v50 = vadd.f32 1e-05, %v1464_v2  ;;  %v1434_v31 = vmul.f32 0.03125, %v2736_v48  ;;  %1559 = vperm.xlu1 %2962, %v1501_v23   ;;  %v1394_v27 = vpop.f32.mrb[43].mxu1  ;;  %v1519_v21 = vmul.f32 %v1503_v4, %v3582_v30  ;;  %v1533_v54 = vsub.f32 %v986_v38, %v1517_v60  ;;  %v976_v30 = vld [vmem:[%s3816_s6 + $0x40] sm:$0xff] }
 0x503   :  { %v2995_v11 = vpop.eup %2994  ;;  %v1479_v55 = vadd.f32 1e-05, %v1463_v47  ;;  %v1433_v36 = vmul.f32 0.03125, %v1394_v27  ;;  %v1506_v7 = vmul.f32 %v2993_v25, %v975_v1  ;;  %v988_v2 = vld [vmem:[%s3817_s7 + $0x20] sm:$0xff]  ;;  %v1536_v48 = vsub.f32 %v989_v63, %v1520_v53  ;;  %v999_v63 = vld [vmem:[%s3817_s7 + $0x78] sm:$0xff] }
 0x504   :  { %3004 = vrsqrt.f32 %v1480_v50  ;;  %v1466_v41 = vsub.f32 %v1434_v31, %v1450_v44  ;;  %v1505_v42 = vmul.f32 %v2995_v11, %v974_v49  ;;  %v1535_v49 = vsub.f32 %v988_v2, %v1519_v21  ;;  %v991_v31 = vld [vmem:[%s3817_s7 + $0x38] sm:$0xff] }
 0x505   :  { %3006 = vrsqrt.f32 %v1479_v55  ;;  %v1465_v6 = vsub.f32 %v1433_v36, %v1449_v26  ;;  %1660 = vperm.xlu0 %2963, %v1534_v29   ;;  %v1522_v23 = vmul.f32 %v1506_v7, %v3584_v35  ;;  %v979_v35 = vld [vmem:[%s3816_s6 + $0x58] sm:$0xff]  ;;  %v980_v26 = vld [vmem:[%s3816_s6 + $0x60] sm:$0xff] }
 0x506   :  { %v2997_v32 = vpop.eup %2996  ;;  %v1482_v37 = vadd.f32 1e-05, %v1466_v41  ;;  %1655 = vperm.xlu1 %2962, %v1533_v54   ;;  %v1521_v51 = vmul.f32 %v1505_v42, %v3590_v39  ;;  %v983_v21 = vld [vmem:[%s3816_s6 + $0x78] sm:$0xff] }
 0x507   :  { %v2999_v60 = vpop.eup %2998  ;;  %v1481_v59 = vadd.f32 1e-05, %v1465_v6  ;;  %v1508_v45 = vmul.f32 %v2997_v32, %v977_v40  ;;  %v1538_v41 = vsub.f32 %v991_v31, %v1522_v23 }
 0x508   :  { %3008 = vrsqrt.f32 %v1482_v37  ;;  %v1507_v3 = vmul.f32 %v2999_v60, %v976_v30  ;;  %v996_v60 = vld [vmem:[%s3817_s7 + $0x60] sm:$0xff] }
 0x509   :  { %3010 = vrsqrt.f32 %v1481_v59  ;;  %1574 = vperm.xlu0 %2963, %v1504_v0   ;;  %v1524_v39 = vmul.f32 %v1508_v45, %v3594_v34  ;;  %v981_v0 = vld [vmem:[%s3816_s6 + $0x68] sm:$0xff] }
 0x50a   :  { %v3001_v1 = vpop.eup %3000  ;;  %1569 = vperm.xlu1 %2962, %v1503_v4   ;;  %v1523_v44 = vmul.f32 %v1507_v3, %v3596_v43 }
 0x50b   :  { %v3003_v47 = vpop.eup %3002  ;;  %v1510_v38 = vmul.f32 %v3001_v1, %v979_v35 }
 0x50c   :  { %v1509_v25 = vmul.f32 %v3003_v47, %v978_v52 }
 0x50d   :  { %1670 = vperm.xlu0 %2963, %v1536_v48   ;;  %v1526_v34 = vmul.f32 %v1510_v38, %v3598_v61  ;;  %v990_v61 = vld [vmem:[%s3817_s7 + $0x30] sm:$0xff] }
 0x50e   :  { %v3005_v50 = vpop.eup %3004  ;;  %1665 = vperm.xlu1 %2962, %v1535_v49   ;;  %v1525_v43 = vmul.f32 %v1509_v25, %v3600_v62  ;;  %v982_v62 = vld [vmem:[%s3816_s6 + $0x70] sm:$0xff]  ;;  %v1537_v40 = vsub.f32 %v990_v61, %v1521_v51  ;;  %v997_v51 = vld [vmem:[%s3817_s7 + $0x68] sm:$0xff] }
 0x50f   :  { %v3007_v4 = vpop.eup %3006  ;;  %v1512_v53 = vmul.f32 %v3005_v50, %v981_v0 }
 0x510   :  { %v1511_v27 = vmul.f32 %v3007_v4, %v980_v26 }
 0x511   :  { %1584 = vperm.xlu0 %2963, %v1506_v7   ;;  %v1528_v11 = vmul.f32 %v1512_v53, %v3604_v5  ;;  %v993_v5 = vld [vmem:[%s3817_s7 + $0x48] sm:$0xff] }
 0x512   :  { %v3009_v55 = vpop.eup %3008  ;;  %1579 = vperm.xlu1 %2962, %v1505_v42   ;;  %v1527_v36 = vmul.f32 %v1511_v27, %v3621_v28  ;;  %v992_v28 = vld [vmem:[%s3817_s7 + $0x40] sm:$0xff]  ;;  %v1540_v42 = vsub.f32 %v993_v5, %v1524_v39 }
 0x513   :  { %v3011_v29 = vpop.eup %3010  ;;  %v1514_v54 = vmul.f32 %v3009_v55, %v983_v21  ;;  %v1539_v23 = vsub.f32 %v992_v28, %v1523_v44  ;;  %v1544_v59 = vsub.f32 %v997_v51, %v1528_v11 }
 0x514   :  { %v1513_v6 = vmul.f32 %v3011_v29, %v982_v62 }
 0x515   :  { %1680 = vperm.xlu0 %2963, %v1538_v41   ;;  %v1530_v7 = vmul.f32 %v1514_v54, %v3637_v56  ;;  %v995_v56 = vld [vmem:[%s3817_s7 + $0x58] sm:$0xff] }
 0x516   :  { %1675 = vperm.xlu1 %2962, %v1537_v40   ;;  %v1529_v30 = vmul.f32 %v1513_v6, %v3654_v12  ;;  %v994_v12 = vld [vmem:[%s3817_s7 + $0x50] sm:$0xff]  ;;  %v1542_v32 = vsub.f32 %v995_v56, %v1526_v34 }
 0x517   :  { %v1541_v37 = vsub.f32 %v994_v12, %v1525_v43  ;;  %v1546_v35 = vsub.f32 %v999_v63, %v1530_v7 }
 0x519   :  { %1594 = vperm.xlu0 %2963, %v1508_v45   ;;  %v1543_v45 = vsub.f32 %v996_v60, %v1527_v36 }
 0x51a   :  { %1589 = vperm.xlu1 %2962, %v1507_v3   ;;  %v998_v3 = vld [vmem:[%s3817_s7 + $0x70] sm:$0xff] }
 0x51b   :  { %v1545_v2 = vsub.f32 %v998_v3, %v1529_v30 }
 0x51d   :  { %1690 = vperm.xlu0 %2963, %v1540_v42  }
 0x51e   :  { %1685 = vperm.xlu1 %2962, %v1539_v23  }
 0x521   :  { %1604 = vperm.xlu0 %2963, %v1510_v38  }
 0x522   :  { %1599 = vperm.xlu1 %2962, %v1509_v25  }
 0x525   :  { %1700 = vperm.xlu0 %2963, %v1542_v32  }
 0x526   :  { %1695 = vperm.xlu1 %2962, %v1541_v37  }
 0x529   :  { %1614 = vperm.xlu0 %2963, %v1512_v53  }
 0x52a   :  { %1609 = vperm.xlu1 %2962, %v1511_v27  }
 0x52d   :  { %1710 = vperm.xlu0 %2963, %v1544_v59  }
 0x52e   :  { %1705 = vperm.xlu1 %2962, %v1543_v45  }
 0x531   :  { %1624 = vperm.xlu0 %2963, %v1514_v54  }
 0x532   :  { %1619 = vperm.xlu1 %2962, %v1513_v6  }
 0x535   :  { %1720 = vperm.xlu0 %2963, %v1546_v35  }
 0x536   :  { %1715 = vperm.xlu1 %2962, %v1545_v2  }
 0x578   :  { %v1555_v39 = vpop.permute.xlu0 %1554 }
 0x579   :  { %v1550_v52 = vpop.permute.xlu1 %1549  ;;  %v1628_v1 = vmul.f32 %v3443_v8, %v1555_v39 }
 0x57a   :  { %v1627_v44 = vmul.f32 %v1550_v52, %v3445_v9 }
 0x57c   :  { %v1651_v47 = vpop.permute.xlu0 %1650 }
 0x57d   :  { %v1724_v48 = vadd.f32 %v1651_v47, %v1628_v1  ;;  %v1646_v38 = vpop.permute.xlu1 %1645 }
 0x57e   :  { %v1723_v49 = vadd.f32 %v1646_v38, %v1627_v44 }
 0x57f   :  { %v1756_v25 = vmul.f32 0.2, %v1724_v48  ;;  %vm1740_vm10 = vcmp.gt.f32.partialorder %v1724_v48, 0.0 }
 0x580   :  { %vm1739_vm11 = vcmp.gt.f32.partialorder %v1723_v49, 0.0  ;;  %v1755_v0 = vmul.f32 0.2, %v1723_v49  ;;  %v1565_v34 = vpop.permute.xlu0 %1564 }
 0x581   :  { %v1560_v26 = vpop.permute.xlu1 %1559  ;;  %v1772_v43 = vsel %vm1740_vm10, %v1724_v48, %v1756_v25  ;;  %v1630_v4 = vmul.f32 %v3451_v10, %v1565_v34 }
 0x582   :  { %v1771_v50 = vsel %vm1739_vm11, %v1723_v49, %v1755_v0  ;;  %v1629_v8 = vmul.f32 %v1560_v26, %v3453_v46  ;;  %vm3047_vm11 = vmmov 0  }
 0x583   :  { %2745 = vmatprep.mubr.msk.f32.mxu0 %vm1000_vm9, %v1771_v50 }
 0x584   :  { %2746 = vmatmul.mubr.msk.f32.vlgmr.msra.gmra.mrb[28].mxu0 %vm1000_vm9, %v1772_v43  ;;  %v1661_v9 = vpop.permute.xlu0 %1660 }
 0x585   :  { %v1726_v53 = vadd.f32 %v1661_v9, %v1630_v4  ;;  %v1656_v31 = vpop.permute.xlu1 %1655 }
 0x586   :  { %v1725_v27 = vadd.f32 %v1656_v31, %v1629_v8 }
 0x587   :  { %v1758_v21 = vmul.f32 0.2, %v1726_v53  ;;  %vm1742_vm12 = vcmp.gt.f32.partialorder %v1726_v53, 0.0 }
 0x588   :  { %vm1741_vm13 = vcmp.gt.f32.partialorder %v1725_v27, 0.0  ;;  %v1757_v61 = vmul.f32 0.2, %v1725_v27  ;;  %v1575_v11 = vpop.permute.xlu0 %1574 }
 0x589   :  { %v1570_v62 = vpop.permute.xlu1 %1569  ;;  %v1632_v36 = vmul.f32 %v3459_v13, %v1575_v11  ;;  %v1774_v10 = vsel %vm1742_vm12, %v1726_v53, %v1758_v21 }
 0x58a   :  { %v1773_v55 = vsel %vm1741_vm13, %v1725_v27, %v1757_v61  ;;  %v1631_v46 = vmul.f32 %v1570_v62, %v3461_v14  ;;  %vm2242_vm13 = vcmask 57344  }
 0x58b   :  { %2748 = vmatprep.mubr.msk.f32.mxu0 %vm1000_vm9, %v1773_v55 }
 0x58c   :  { %2749 = vmatmul.mubr.msk.f32.gmra.mrb[30].mxu0 %vm1000_vm9, %v1774_v10  ;;  %v1671_v29 = vpop.permute.xlu0 %1670 }
 0x58d   :  { %v1728_v41 = vadd.f32 %v1671_v29, %v1632_v36  ;;  %v1666_v54 = vpop.permute.xlu1 %1665 }
 0x58e   :  { %v1727_v40 = vadd.f32 %v1666_v54, %v1631_v46 }
 0x58f   :  { %v1760_v6 = vmul.f32 0.2, %v1728_v41  ;;  %vm1744_vm14 = vcmp.gt.f32.partialorder %v1728_v41, 0.0 }
 0x590   :  { %vm1743_vm15 = vcmp.gt.f32.partialorder %v1727_v40, 0.0  ;;  %v1759_v7 = vmul.f32 0.2, %v1727_v40  ;;  %v1585_v30 = vpop.permute.xlu0 %1584 }
 0x591   :  { %v1580_v5 = vpop.permute.xlu1 %1579  ;;  %v1634_v13 = vmul.f32 %v3467_v15, %v1585_v30  ;;  %v1776_v42 = vsel %vm1744_vm14, %v1728_v41, %v1760_v6 }
 0x592   :  { %v1775_v28 = vsel %vm1743_vm15, %v1727_v40, %v1759_v7  ;;  %v1633_v14 = vmul.f32 %v1580_v5, %v3469_v33 }
 0x593   :  { %2751 = vmatprep.mubr.msk.f32.mxu0 %vm1000_vm9, %v1775_v28 }
 0x594   :  { %2752 = vmatmul.mubr.msk.f32.gmra.mrb[32].mxu0 %vm1000_vm9, %v1776_v42  ;;  %v1681_v23 = vpop.permute.xlu0 %1680 }
 0x595   :  { %v1730_v56 = vadd.f32 %v1681_v23, %v1634_v13  ;;  %v1676_v12 = vpop.permute.xlu1 %1675 }
 0x596   :  { %v1729_v32 = vadd.f32 %v1676_v12, %v1633_v14 }
 0x597   :  { %v1762_v37 = vmul.f32 0.2, %v1730_v56  ;;  %vm1746_vm0 = vcmp.gt.f32.partialorder %v1730_v56, 0.0 }
 0x598   :  { %vm1745_vm1 = vcmp.gt.f32.partialorder %v1729_v32, 0.0  ;;  %v1761_v51 = vmul.f32 0.2, %v1729_v32  ;;  %v1595_v60 = vpop.permute.xlu0 %1594 }
 0x599   :  { %v1590_v59 = vpop.permute.xlu1 %1589  ;;  %v1636_v15 = vmul.f32 %v3475_v57, %v1595_v60  ;;  %v1778_v63 = vsel %vm1746_vm0, %v1730_v56, %v1762_v37 }
 0x59a   :  { %v1777_v45 = vsel %vm1745_vm1, %v1729_v32, %v1761_v51  ;;  %v1635_v33 = vmul.f32 %v1590_v59, %v3477_v16 }
 0x59b   :  { %2754 = vmatprep.mubr.msk.f32.mxu0 %vm1000_vm9, %v1777_v45 }
 0x59c   :  { %2755 = vmatmul.mubr.msk.f32.gmra.mrb[34].mxu0 %vm1000_vm9, %v1778_v63  ;;  %v1691_v3 = vpop.permute.xlu0 %1690 }
 0x59d   :  { %v1732_v35 = vadd.f32 %v1691_v3, %v1636_v15  ;;  %v1686_v2 = vpop.permute.xlu1 %1685 }
 0x59e   :  { %v1731_v39 = vadd.f32 %v1686_v2, %v1635_v33 }
 0x59f   :  { %v1764_v52 = vmul.f32 0.2, %v1732_v35  ;;  %vm1748_vm2 = vcmp.gt.f32.partialorder %v1732_v35, 0.0 }
 0x5a0   :  { %vm1747_vm3 = vcmp.gt.f32.partialorder %v1731_v39, 0.0  ;;  %v1763_v1 = vmul.f32 0.2, %v1731_v39  ;;  %v1605_v44 = vpop.permute.xlu0 %1604 }
 0x5a1   :  { %v1600_v47 = vpop.permute.xlu1 %1599  ;;  %v1638_v57 = vmul.f32 %v3483_v58, %v1605_v44  ;;  %v1780_v38 = vsel %vm1748_vm2, %v1732_v35, %v1764_v52 }
 0x5a2   :  { %v1779_v48 = vsel %vm1747_vm3, %v1731_v39, %v1763_v1  ;;  %v1637_v16 = vmul.f32 %v1600_v47, %v3485_v18  ;;  %v1984_v47 = vld [vmem:[%s3819_s9] sm:$0x1]  ;;  %s3050_s9 = smov [#allocation4]  }
 0x5a3   :  { %2757 = vmatprep.mubr.msk.f32.mxu0 %vm1000_vm9, %v1779_v48  ;;  %v3049_v48 = vmov 1.0   ;;  %s2250_s19 = sshll.u32 %s3050_s9, 4  ;;  %s2251_s19 = int_to_ptr.vmem [resolvable:$true] %s2250_s19 }
 0x5a4   :  { %2758 = vmatmul.mubr.msk.f32.gmra.mrb[36].mxu0 %vm1000_vm9, %v1780_v38  ;;  %v1701_v49 = vpop.permute.xlu0 %1700  ;;  %s3018_s2 = scalar_lea.vmem %s2251_s19, 16  ;;  %s3022_s3 = scalar_lea.vmem %s2251_s19, 32 }
 0x5a5   :  { %v1734_v25 = vadd.f32 %v1701_v49, %v1638_v57  ;;  %v1696_v0 = vpop.permute.xlu1 %1695  ;;  %p3019_p0 = scmp.ne.s32.totalorder %s2251_s19, %s3018_s2  ;;  %p3023_p1 = scmp.lt.s32.totalorder %s2251_s19, %s2251_s19 }
 0x5a6   :  { %v1733_v34 = vadd.f32 %v1696_v0, %v1637_v16  ;;  %p3024_p2 = scmp.lt.s32.totalorder %s3022_s3, %s3018_s2 }
 0x5a7   :  { %v1766_v26 = vmul.f32 0.2, %v1734_v25  ;;  %vm1750_vm4 = vcmp.gt.f32.partialorder %v1734_v25, 0.0 }
 0x5a8   :  { %vm1749_vm5 = vcmp.gt.f32.partialorder %v1733_v34, 0.0  ;;  %v1765_v50 = vmul.f32 0.2, %v1733_v34  ;;  %v1615_v43 = vpop.permute.xlu0 %1614  ;;  %p3025_p3 = por %p3024_p2, %p3023_p1 }
 0x5a9   :  { %v1610_v4 = vpop.permute.xlu1 %1609  ;;  %v1640_v58 = vmul.f32 %v3491_v19, %v1615_v43  ;;  %v1782_v9 = vsel %vm1750_vm4, %v1734_v25, %v1766_v26 }
 0x5aa   :  { %v1781_v8 = vsel %vm1749_vm5, %v1733_v34, %v1765_v50  ;;  %v1639_v18 = vmul.f32 %v1610_v4, %v3493_v20  ;;  %p3026_p4 = pnand %p3025_p3, %p3019_p0 }
 0x5ab   :  { %2760 = vmatprep.mubr.msk.f32.mxu0 %vm1000_vm9, %v1781_v8 }
 0x5ac   :  { %2761 = vmatmul.mubr.msk.f32.gmra.mrb[38].mxu0 %vm1000_vm9, %v1782_v9  ;;  %v1711_v53 = vpop.permute.xlu0 %1710 }
 0x5ad   :  { %v1736_v31 = vadd.f32 %v1711_v53, %v1640_v58  ;;  %v1706_v27 = vpop.permute.xlu1 %1705  ;;  %v2055_v58 = vld [vmem:[#allocation2] sm:$0x1]  ;;  %v2056_v53 = vld [vmem:[#allocation3] sm:$0x1] }
 0x5ae   :  { %v1735_v21 = vadd.f32 %v1706_v27, %v1639_v18 }
 0x5af   :  { %v1768_v61 = vmul.f32 0.2, %v1736_v31  ;;  %vm1752_vm6 = vcmp.gt.f32.partialorder %v1736_v31, 0.0 }
 0x5b0   :  { %vm1751_vm7 = vcmp.gt.f32.partialorder %v1735_v21, 0.0  ;;  %v1767_v11 = vmul.f32 0.2, %v1735_v21  ;;  %v1625_v62 = vpop.permute.xlu0 %1624 }
 0x5b1   :  { %v1620_v55 = vpop.permute.xlu1 %1619  ;;  %v1642_v19 = vmul.f32 %v3499_v22, %v1625_v62  ;;  %v1784_v10 = vsel %vm1752_vm6, %v1736_v31, %v1768_v61  ;;  %v3046_v22 = vmov 0.0|0.0  }
 0x5b2   :  { %v1783_v36 = vsel %vm1751_vm7, %v1735_v21, %v1767_v11  ;;  %v1641_v20 = vmul.f32 %v1620_v55, %v3502_v24  ;;  %2910 = vmatprep.subr.bf16.mxu1 %v3046_v22  ;;  %v3048_v24 = vmov 0.0  }
 0x5b3   :  { %2763 = vmatprep.mubr.msk.f32.mxu0 %vm1000_vm9, %v1783_v36  ;;  %2801 = vmatprep.mubr.msk.f32.mxu1 %vm3047_vm11, %v3048_v24 }
 0x5b4   :  { %2764 = vmatmul.mubr.msk.f32.gmra.mrb[40].mxu0 %vm1000_vm9, %v1784_v10  ;;  %v1721_v46 = vpop.permute.xlu0 %1720 }
 0x5b5   :  { %v1738_v29 = vadd.f32 %v1721_v46, %v1642_v19  ;;  %v1716_v41 = vpop.permute.xlu1 %1715 }
 0x5b6   :  { %v1737_v54 = vadd.f32 %v1716_v41, %v1641_v20 }
 0x5b7   :  { %v1770_v40 = vmul.f32 0.2, %v1738_v29  ;;  %vm1754_vm8 = vcmp.gt.f32.partialorder %v1738_v29, 0.0 }
 0x5b8   :  { %vm1753_vm10 = vcmp.gt.f32.partialorder %v1737_v54, 0.0  ;;  %v1769_v6 = vmul.f32 0.2, %v1737_v54 }
 0x5b9   :  { %v1786_v30 = vsel %vm1754_vm8, %v1738_v29, %v1770_v40 }
 0x5ba   :  { %v1785_v7 = vsel %vm1753_vm10, %v1737_v54, %v1769_v6 }
 0x5bb   :  { %2766 = vmatprep.mubr.msk.f32.mxu0 %vm1000_vm9, %v1785_v7 }
 0x5bc   :  { %2767 = vmatmul.mubr.msk.f32.gmra.mrb[42].mxu0 %vm1000_vm9, %v1786_v30  ;;  %vm2057_vm9 = vcmask 64512  }
 0x657   :  { %v2747_v5 = vpop.f32.mrb[28].mxu0 }
 0x658   :  { %v1905_v28 = vpop.f32.mrb[29].mxu0 }
 0x659   :  { %v2911_v13 = vpack.c.bf16 %v2747_v5, %v1905_v28 }
 0x65b   :  { %2912 = vmatpush3.bf16.msra.mxu1 %v2911_v13 }
 0x65c   :  { %2913 = vmatprep.subr.bf16.mxu1 %v3046_v22 }
 0x65f   :  { %v2750_v42 = vpop.f32.mrb[30].mxu0 }
 0x660   :  { %v1915_v14 = vpop.f32.mrb[31].mxu0 }
 0x661   :  { %v2914_v23 = vpack.c.bf16 %v2750_v42, %v1915_v14 }
 0x663   :  { %2915 = vmatpush3.bf16.msra.mxu1 %v2914_v23 }
 0x664   :  { %2916 = vmatprep.subr.bf16.mxu1 %v3046_v22 }
 0x667   :  { %v2753_v56 = vpop.f32.mrb[32].mxu0 }
 0x668   :  { %v1925_v12 = vpop.f32.mrb[33].mxu0 }
 0x669   :  { %v2917_v32 = vpack.c.bf16 %v2753_v56, %v1925_v12 }
 0x66b   :  { %2918 = vmatpush3.bf16.msra.mxu1 %v2917_v32 }
 0x66c   :  { %2919 = vmatprep.subr.bf16.mxu1 %v3046_v22 }
 0x66f   :  { %v2756_v37 = vpop.f32.mrb[34].mxu0 }
 0x670   :  { %v1935_v51 = vpop.f32.mrb[35].mxu0 }
 0x671   :  { %v2920_v60 = vpack.c.bf16 %v2756_v37, %v1935_v51 }
 0x673   :  { %2921 = vmatpush3.bf16.msra.mxu1 %v2920_v60 }
 0x674   :  { %2922 = vmatprep.subr.bf16.mxu1 %v3046_v22 }
 0x677   :  { %v2759_v59 = vpop.f32.mrb[36].mxu0 }
 0x678   :  { %v1945_v45 = vpop.f32.mrb[37].mxu0 }
 0x679   :  { %v2923_v15 = vpack.c.bf16 %v2759_v59, %v1945_v45 }
 0x67b   :  { %2924 = vmatpush3.bf16.msra.mxu1 %v2923_v15 }
 0x67c   :  { %2925 = vmatprep.subr.bf16.mxu1 %v3046_v22 }
 0x67f   :  { %v2762_v63 = vpop.f32.mrb[38].mxu0 }
 0x680   :  { %v1955_v33 = vpop.f32.mrb[39].mxu0 }
 0x681   :  { %v2926_v3 = vpack.c.bf16 %v2762_v63, %v1955_v33 }
 0x683   :  { %2927 = vmatpush3.bf16.msra.mxu1 %v2926_v3 }
 0x684   :  { %2928 = vmatprep.subr.bf16.mxu1 %v3046_v22 }
 0x687   :  { %v2765_v35 = vpop.f32.mrb[40].mxu0 }
 0x688   :  { %v1965_v2 = vpop.f32.mrb[41].mxu0 }
 0x689   :  { %v2929_v39 = vpack.c.bf16 %v2765_v35, %v1965_v2 }
 0x68b   :  { %2930 = vmatpush3.bf16.msra.mxu1 %v2929_v39 }
 0x68c   :  { %2931 = vmatprep.subr.bf16.mxu1 %v3046_v22 }
 0x68f   :  { %v2768_v52 = vpop.f32.mrb[42].mxu0 }
 0x690   :  { %v1975_v1 = vpop.f32.mrb[43].mxu0 }
 0x691   :  { %v2932_v44 = vpack.c.bf16 %v2768_v52, %v1975_v1 }
 0x693   :  { %2933 = vmatpush3.bf16.msra.mxu1 %v2932_v44 }
 0x694   :  { %2804 = vmatprep.subr.mxu1 %v3048_v24 }
 0x696   :  { %2802 = vmatmul.mubr.f32.vlgmr.msra.gmra.mrb[44].mxu1 %v1984_v47 }
 0x697   :  { %2805 = vmatpush3.msra.mxu1 %v3049_v48  ;;  %2806 = vmatprep.mubr.msk.f32.mxu1 %vm3047_vm11, %v3048_v24 }
 0x698   :  { %2809 = vmatprep.subr.mxu1 %v3048_v24 }
 0x769   :  { %v2051_v57 = vpop.f32.mrb[44].mxu1 }
 0x76a   :  { %v2803_v38 = vpop.f32.mrb[45].mxu1  ;;  %2807 = vmatmul.mubr.msk.f32.vlgmr.msra.gmra.mrb[46].mxu1 %vm2057_vm9, %v2051_v57  ;;  %v2131_v16 = vmul.f32 %v2051_v57, %v2051_v57 }
 0x76b   :  { %2810 = vmatpush3.msra.mxu1 %v3049_v48  ;;  %2811 = vmatprep.mubr.msk.f32.mxu1 %vm3047_vm11, %v3048_v24 }
 0x76e   :  { %2812 = vmatmul.mubr.msk.f32.vlgmr.msra.gmra.mrb[48].mxu1 %vm2057_vm9, %v2131_v16 }
 0x83d   :  { %v2127_v49 = vpop.f32.mrb[46].mxu1 }
 0x83e   :  { %v2205_v25 = vmul.f32 0.125, %v2127_v49  ;;  %v2808_v0 = vpop.f32.mrb[47].mxu1 }
 0x840   :  { %v2207_v26 = vmul.f32 %v2205_v25, %v2205_v25 }
 0x841   :  { %v2201_v34 = vpop.f32.mrb[48].mxu1 }
 0x842   :  { %v2206_v50 = vmul.f32 0.125, %v2201_v34  ;;  %v2813_v43 = vpop.f32.mrb[49].mxu1 }
 0x844   :  { %v2208_v4 = vsub.f32 %v2206_v50, %v2207_v26 }
 0x846   :  { %v2209_v8 = vadd.f32 1e-05, %v2208_v4 }
 0x848   :  { %3012 = vrsqrt.f32 %v2209_v8 }
 0x852   :  { %v3013_v9 = vpop.eup %3012 }
 0x853   :  { %v2211_v18 = vmul.f32 %v3013_v9, %v2055_v58 }
 0x855   :  { %2216 = vperm.xlu1 %2962, %v2211_v18   ;;  %v2212_v31 = vmul.f32 %v2211_v18, %v2205_v25 }
 0x857   :  { %v2213_v27 = vsub.f32 %v2056_v53, %v2212_v31 }
 0x859   :  { %2226 = vperm.xlu0 %2963, %v2213_v27  }
 0x8d4   :  { %v2217_v21 = vpop.permute.xlu1 %2216 }
 0x8d5   :  { %v2222_v61 = vrot.slane %v2217_v21, %v3190_v17 }
 0x8d7   :  { %v2223_v62 = vmul.f32 %v2222_v61, %v2051_v57 }
 0x8d8   :  { %v2227_v11 = vpop.permute.xlu0 %2226 }
 0x8d9   :  { %v2232_v55 = vrot.slane %v2227_v11, %v3190_v17 }
 0x8db   :  { %v2233_v36 = vadd.f32 %v2232_v55, %v2223_v62 }
 0x8dd   :  { %vm2234_vm12 = vcmp.gt.f32.partialorder %v2233_v36, 0.0  ;;  %v2235_v19 = vmul.f32 0.2, %v2233_v36 }
 0x8df   :  { %v2236_v10 = vsel %vm2234_vm12, %v2233_v36, %v2235_v19 }
 0x8e0   :  { %v2237_v20 = vsub.f32 0.0, %v2236_v10 }
 0x8e2   :  { %v2238_v46 = vmul.f32 1.442695, %v2237_v20 }
 0x8e4   :  { %3014 = vpow2.f32 %v2238_v46 }
 0x8ee   :  { %v3015_v29 = vpop.eup %3014 }
 0x8ef   :  { %v2240_v41 = vadd.f32 1.0, %v3015_v29 }
 0x8f1   :  { %3016 = vrcp.f32 %v2240_v41 }
 0x8fb   :  { %v3017_v54 = vpop.eup %3016 }
 0x8fc   :  { %2243 = vst.msk [vmem:[#allocation4] sm:$0x1] %vm2242_vm13, %v3017_v54 }
 0x8fd   :  { %3029 = shalt.err (!%p3026_p4)
}
 0x8fe   :  { %s3030_s1 = scalar_lea.hbm %s3821_s12, 16 }
 0x8ff   :  { %p3031_p5 = scmp.ne.s32.totalorder %s3821_s12, %s3030_s1  ;;  %p3034_p6 = scmp.lt.u32.totalorder %s3030_s1, %s3821_s12 }
 0x901   :  { %p3036_p7 = pnand %p3034_p6, %p3031_p5 }
 0x903   :  { %3039 = shalt.err (!%p3036_p7)
}
 0x904   :  { %2253 = dma.vmem_to_hbm [thread:$0]  %s2251_s19, 16, %s3821_s12, [#allocation5]  }
 0x905   :  { %3040 = dma.done.wait [#allocation5], 16  }
 0x906   :  { %3041 = vsyncadd [#allocation5], 4294967280 }
 0x907   :  { %2257 = vsyncpa [#allocation5], 1 }

</bundles_post_ra>
